<compile_context>
chip_gen: v7x
topology: tpu7x:2x2x1
jax: 0.10.0
libtpu: 0.0.40
codegen_flags: <defaults>
</compile_context>

<pallas_src>
import functools

import jax
import jax.numpy as jnp
from jax.experimental import pallas as pl
from jax.experimental.pallas import tpu as pltpu

EPS = 1e-5
NEG_INF = -1e9


# ------------------------------ shared math ---------------------------------

def _layernorm(x, w, b):
    mu = jnp.mean(x, axis=-1, keepdims=True)
    var = jnp.mean((x - mu) ** 2, axis=-1, keepdims=True)
    return (x - mu) * jax.lax.rsqrt(var + EPS) * w + b


def _mm(a, b):
    """bf16 MXU operands, f32 accumulation (reference path)."""
    return jnp.dot(a.astype(jnp.bfloat16), b.astype(jnp.bfloat16),
                   preferred_element_type=jnp.float32)


# ------------------------------ Pallas kernel --------------------------------

def clip_encoder_kernel(x_ref, wqkv_ref, wo_ref, w1_ref, w2_ref,
                        vecs_ref, b1_ref, fln_ref,
                        o_ref, acc_ref,
                        *, num_heads, head_dim, seq_len):
    """Fused CLIP text transformer stack: grid = (batch_tile, layer).

    Activations (batch folded into rows) live in a VMEM scratch accumulator
    across layer steps; the final layer-norm is applied and the output block
    is written only on the last layer step.
    """
    l = pl.program_id(1)
    n_layers = pl.num_programs(1)

    @pl.when(l == 0)
    def _():
        acc_ref[...] = x_ref[...]          # embeddings -> accumulator

    x = acc_ref[...]                       # (N, D) f32, N = batch_tile * L
    n_rows, d = x.shape
    scale = head_dim ** -0.5

    # Packed per-layer vectors: one (9, D) DMA instead of nine tiny ones.
    vecs = vecs_ref[...]
    ln1_w, ln1_b = vecs[0:1], vecs[1:2]
    bq, bk, bv = vecs[2:3], vecs[3:4], vecs[4:5]
    bo = vecs[5:6]
    ln2_w, ln2_b = vecs[6:7], vecs[7:8]
    b2 = vecs[8:9]

    # Block-diagonal causal bias, generated in-kernel (no HBM input).
    row = jax.lax.broadcasted_iota(jnp.int32, (n_rows, n_rows), 0)
    col = jax.lax.broadcasted_iota(jnp.int32, (n_rows, n_rows), 1)
    causal = col <= row
    same = jnp.zeros((n_rows, n_rows), dtype=jnp.bool_)
    for b in range(n_rows // seq_len):     # static, tiny unroll over batch blocks
        lo, hi = b * seq_len, (b + 1) * seq_len
        in_b = jnp.logical_and(jnp.logical_and(row >= lo, row < hi),
                               jnp.logical_and(col >= lo, col < hi))
        same = jnp.logical_or(same, in_b)
    bias = jnp.where(jnp.logical_and(causal, same), 0.0, NEG_INF)
    bias = bias.astype(jnp.float32)

    # --- causal multi-head self-attention (pre-LN) ---------------------------
    h = _layernorm(x, ln1_w, ln1_b).astype(jnp.bfloat16)       # cast once
    qkv = jnp.dot(h, wqkv_ref[...], preferred_element_type=jnp.float32)
    q = ((qkv[:, :d] + bq) * scale).astype(jnp.bfloat16)       # lane-dense slices
    k = (qkv[:, d:2 * d] + bk).astype(jnp.bfloat16)
    v = (qkv[:, 2 * d:] + bv).astype(jnp.bfloat16)

    ctx_heads = []
    for hi in range(num_heads):            # tiny (N,N) per-head score math only
        sl = slice(hi * head_dim, (hi + 1) * head_dim)
        s = jax.lax.dot_general(q[:, sl], k[:, sl],
                                dimension_numbers=(((1,), (1,)), ((), ())),
                                preferred_element_type=jnp.float32) + bias
        s = s - jnp.max(s, axis=-1, keepdims=True)
        p = jnp.exp(s)
        p = p * pl.reciprocal(jnp.sum(p, axis=-1, keepdims=True), approx=True)
        ctx_heads.append(jnp.dot(p.astype(jnp.bfloat16), v[:, sl],
                                 preferred_element_type=jnp.float32))
    ctx = jnp.concatenate(ctx_heads, axis=-1).astype(jnp.bfloat16)   # (N, D)
    x = x + jnp.dot(ctx, wo_ref[...], preferred_element_type=jnp.float32) + bo

    # --- MLP (quick-GELU), pre-LN --------------------------------------------
    h2 = _layernorm(x, ln2_w, ln2_b).astype(jnp.bfloat16)
    a = jnp.dot(h2, w1_ref[...], preferred_element_type=jnp.float32) + b1_ref[...]
    a = a * jax.nn.sigmoid(1.702 * a)      # quick_gelu in f32
    x = x + jnp.dot(a.astype(jnp.bfloat16), w2_ref[...],
                    preferred_element_type=jnp.float32) + b2

    acc_ref[...] = x                       # persists to the next layer step

    @pl.when(l == n_layers - 1)
    def _():
        fln = fln_ref[...]
        o_ref[...] = _layernorm(x, fln[0:1], fln[1:2])


def pallas_clip_encoder(x_emb, stacked, *, num_heads, head_dim, batch_tile=None):
    """One pallas_call for the whole transformer stack of one text encoder."""
    B, L, D = x_emb.shape
    if batch_tile is None:
        batch_tile = B                      # fold whole batch -> weights streamed once
    assert B % batch_tile == 0
    n_layers = stacked['wqkv'].shape[0]
    F = stacked['w1'].shape[-1]
    Nt = batch_tile * L

    x_flat = x_emb.reshape(B * L, D).astype(jnp.float32)

    def wspec(r, c):
        # stacked per-layer array (n_layers, r, c): stream layer l each step
        return pl.BlockSpec((None, r, c), lambda bt, l: (l, 0, 0))

    in_specs = [
        pl.BlockSpec((Nt, D), lambda bt, l: (bt, 0)),      # embeddings (fetched once/bt)
        wspec(D, 3 * D),                                   # fused Wqkv
        wspec(D, D),                                       # Wo
        wspec(D, F),                                       # W1
        wspec(F, D),                                       # W2
        wspec(9, D),                                       # packed LN/bias vectors
        wspec(1, F),                                       # b1
        pl.BlockSpec((2, D), lambda bt, l: (0, 0)),        # final LN (w; b)
    ]

    out = pl.pallas_call(
        functools.partial(clip_encoder_kernel, num_heads=num_heads,
                          head_dim=head_dim, seq_len=L),
        grid=(B // batch_tile, n_layers),
        out_shape=jax.ShapeDtypeStruct((B * L, D), jnp.float32),
        in_specs=in_specs,
        out_specs=pl.BlockSpec((Nt, D), lambda bt, l: (bt, 0)),
        scratch_shapes=[pltpu.VMEM((Nt, D), jnp.float32)],
        compiler_params=pltpu.CompilerParams(
            dimension_semantics=("parallel", "arbitrary"),
            vmem_limit_bytes=48 * 1024 * 1024),
    )(x_flat, stacked['wqkv'], stacked['wo'], stacked['w1'], stacked['w2'],
      stacked['vecs'], stacked['b1'], stacked['fln'])
    return out.reshape(B, L, D)


# --------------------------- CLIP text model (JAX glue) ----------------------

def clip_text_model_forward(params, input_ids, *, use_pallas=True):
    B, L = input_ids.shape
    D = params['token_emb'].shape[-1]
    tok = params['token_emb'][input_ids]                # (B, L, D) gather
    pos = params['pos_emb'][:L][None, :, :]             # (1, L, D)
    x = (tok + pos).astype(jnp.float32)

    if use_pallas:
        x = pallas_clip_encoder(x, params['stacked'],
                                num_heads=params['num_heads'],
                                head_dim=D // params['num_heads'])
    else:
        for lp in params['layers']:
            x = clip_layer_ref(x, lp, params['num_heads'])
        x = _layernorm(x, params['final_ln_w'], params['final_ln_b'])

    # CLIP pooling: hidden state at the EOS token (token with max id)
    eos_idx = jnp.argmax(input_ids, axis=-1)
    pooled = x[jnp.arange(B), eos_idx]                   # (B, D)
    return x, pooled


def multi_text_encoder_forward(params_dict, input_ids_dict, cat_dim=-1,
                               *, use_pallas=True):
    """Equivalent of MultiTextEncoder.forward (return_dict=False)."""
    lhs, pooled = [], []
    for name, params in params_dict.items():
        h, p = clip_text_model_forward(params, input_ids_dict[name],
                                       use_pallas=use_pallas)
        lhs.append(h)
        pooled.append(p)
    last_hidden_state = jnp.concatenate(lhs, axis=cat_dim)
    pooler_output = jnp.concatenate(pooled, axis=cat_dim)
    # TODO(synk): output_hidden_states / output_attentions paths not exercised
    # (they are None here, matching hidden_states=None in the reference use).
    return last_hidden_state, pooler_output


# --------------------------- pure-JAX reference ------------------------------

def clip_layer_ref(x, lp, num_heads):
    B, L, D = x.shape
    hd = D // num_heads
    scale = hd ** -0.5
    h = _layernorm(x, lp['ln1_w'], lp['ln1_b']).reshape(B * L, D)
    q = ((_mm(h, lp['wq']) + lp['bq']) * scale).reshape(B, L, num_heads, hd)
    k = (_mm(h, lp['wk']) + lp['bk']).reshape(B, L, num_heads, hd)
    v = (_mm(h, lp['wv']) + lp['bv']).reshape(B, L, num_heads, hd)
    s = jnp.einsum('bqhd,bkhd->bhqk', q.astype(jnp.bfloat16),
                   k.astype(jnp.bfloat16), preferred_element_type=jnp.float32)
    row = jnp.arange(L)[:, None]
    col = jnp.arange(L)[None, :]
    s = s + jnp.where(col <= row, 0.0, NEG_INF)[None, None]
    p = jax.nn.softmax(s, axis=-1)
    ctx = jnp.einsum('bhqk,bkhd->bqhd', p.astype(jnp.bfloat16),
                     v.astype(jnp.bfloat16),
                     preferred_element_type=jnp.float32).reshape(B * L, D)
    x = x + (_mm(ctx, lp['wo']) + lp['bo']).reshape(B, L, D)
    h = _layernorm(x, lp['ln2_w'], lp['ln2_b']).reshape(B * L, D)
    a = _mm(h, lp['w1']) + lp['b1']
    a = a * jax.nn.sigmoid(1.702 * a)
    return x + (_mm(a, lp['w2']) + lp['b2']).reshape(B, L, D)


# --------------------------- parameter construction --------------------------

def pack_layers(params):
    """Stack per-layer weights (leading layer axis), fuse QKV, pack vectors."""
    layers = params['layers']
    bf16 = jnp.bfloat16
    wqkv = jnp.stack([jnp.concatenate([lp['wq'], lp['wk'], lp['wv']], axis=1)
                      for lp in layers]).astype(bf16)            # (nl, D, 3D)
    wo = jnp.stack([lp['wo'] for lp in layers]).astype(bf16)     # (nl, D, D)
    w1 = jnp.stack([lp['w1'] for lp in layers]).astype(bf16)     # (nl, D, F)
    w2 = jnp.stack([lp['w2'] for lp in layers]).astype(bf16)     # (nl, F, D)
    # 9 lane-dense rows: ln1_w, ln1_b, bq, bk, bv, bo, ln2_w, ln2_b, b2
    vecs = jnp.stack([jnp.concatenate(
        [lp['ln1_w'], lp['ln1_b'], lp['bq'], lp['bk'], lp['bv'],
         lp['bo'], lp['ln2_w'], lp['ln2_b'], lp['b2']], axis=0)
        for lp in layers]).astype(jnp.float32)                   # (nl, 9, D)
    b1 = jnp.stack([lp['b1'] for lp in layers]).astype(jnp.float32)  # (nl, 1, F)
    fln = jnp.concatenate([params['final_ln_w'], params['final_ln_b']],
                          axis=0).astype(jnp.float32)            # (2, D)
    # TODO(synk): on v7x, weights could be stored fp8 to halve HBM streaming.
    return dict(wqkv=wqkv, wo=wo, w1=w1, w2=w2, vecs=vecs, b1=b1, fln=fln)


def init_clip_params(key, vocab, max_pos, hidden, n_layers, n_heads, ffn):
    keys = jax.random.split(key, 2 + n_layers)
    init = lambda k, shape: (0.02 * jax.random.normal(k, shape, jnp.float32))
    params = {
        'num_heads': n_heads,
        'token_emb': init(keys[0], (vocab, hidden)),
        'pos_emb': init(keys[1], (max_pos, hidden)),
        'final_ln_w': jnp.ones((1, hidden), jnp.float32),
        'final_ln_b': jnp.zeros((1, hidden), jnp.float32),
        'layers': [],
    }
    for li in range(n_layers):
        lk = jax.random.split(keys[2 + li], 6)
        params['layers'].append({
            'ln1_w': jnp.ones((1, hidden), jnp.float32),
            'ln1_b': jnp.zeros((1, hidden), jnp.float32),
            'wq': init(lk[0], (hidden, hidden)), 'bq': jnp.zeros((1, hidden), jnp.float32),
            'wk': init(lk[1], (hidden, hidden)), 'bk': jnp.zeros((1, hidden), jnp.float32),
            'wv': init(lk[2], (hidden, hidden)), 'bv': jnp.zeros((1, hidden), jnp.float32),
            'wo': init(lk[3], (hidden, hidden)), 'bo': jnp.zeros((1, hidden), jnp.float32),
            'ln2_w': jnp.ones((1, hidden), jnp.float32),
            'ln2_b': jnp.zeros((1, hidden), jnp.float32),
            'w1': init(lk[4], (hidden, ffn)), 'b1': jnp.zeros((1, ffn), jnp.float32),
            'w2': init(lk[5], (ffn, hidden)), 'b2': jnp.zeros((1, hidden), jnp.float32),
        })
    params['stacked'] = pack_layers(params)
    return params


# ------------------------------------ main -----------------------------------

if __name__ == "__main__":
    B, L, VOCAB, MAX_POS = 2, 8, 64, 8

    root = jax.random.PRNGKey(0)
    k_a, k_b, k_ids_a, k_ids_b = jax.random.split(root, 4)

    # Two "CLIP text models" with different lane-dense hidden sizes
    # (like clip_B(768) / clip_bigG(1280), both multiples of 128).
    params_dict = {
        'clip_B':    init_clip_params(k_a, VOCAB, MAX_POS, hidden=128,
                                      n_layers=2, n_heads=4, ffn=512),
        'clip_bigG': init_clip_params(k_b, VOCAB, MAX_POS, hidden=256,
                                      n_layers=2, n_heads=8, ffn=1024),
    }

    def make_ids(k):
        ids = jax.random.randint(k, (B, L), 1, VOCAB - 1)
        # put EOS (max token id) at the last position so argmax pooling is defined
        return ids.at[:, -1].set(VOCAB - 1)

    input_ids_dict = {
        'clip_B':    make_ids(k_ids_a),
        'clip_bigG': make_ids(k_ids_b),
    }

    last_hidden, pooled = multi_text_encoder_forward(params_dict, input_ids_dict)
    last_hidden = jax.block_until_ready(last_hidden)
    pooled = jax.block_until_ready(pooled)

    # reference (pure JAX, same bf16-matmul numerics) check
    ref_lh, ref_po = multi_text_encoder_forward(params_dict, input_ids_dict,
                                                use_pallas=False)

    assert last_hidden.shape == (B, L, 128 + 256), last_hidden.shape
    assert pooled.shape == (B, 128 + 256), pooled.shape
    assert bool(jnp.all(jnp.isfinite(last_hidden)))
    assert bool(jnp.allclose(last_hidden, ref_lh, atol=2e-2, rtol=2e-2))
    assert bool(jnp.allclose(pooled, ref_po, atol=2e-2, rtol=2e-2))

    print("KERNEL_OK")
</pallas_src>

<mosaic_0001>
module attributes {stable_mosaic.version = 11 : i64} {
  func.func @clip_encoder_kernel(%arg0: i32, %arg1: i32, %arg2: memref<16x128xf32, #tpu.memory_space<vmem>>, %arg3: memref<1x128x384xbf16, #tpu.memory_space<vmem>>, %arg4: memref<1x128x128xbf16, #tpu.memory_space<vmem>>, %arg5: memref<1x128x512xbf16, #tpu.memory_space<vmem>>, %arg6: memref<1x512x128xbf16, #tpu.memory_space<vmem>>, %arg7: memref<1x9x128xf32, #tpu.memory_space<vmem>>, %arg8: memref<1x1x512xf32, #tpu.memory_space<vmem>>, %arg9: memref<2x128xf32, #tpu.memory_space<vmem>>, %arg10: memref<16x128xf32, #tpu.memory_space<vmem>>, %arg11: memref<16x128xf32, #tpu.memory_space<vmem>>) attributes {dimension_semantics = [#tpu.dimension_semantics<parallel>, #tpu.dimension_semantics<arbitrary>], iteration_bounds = array<i64: 1, 2>, scalar_prefetch = 0 : i64, scratch_operands = 1 : i64, tpu.core_type = #tpu.core_type<tc>, window_params = [{transform_indices = @transform_0, window_bounds = array<i64: 16, 128>}, {transform_indices = @transform_1, window_bounds = array<i64: 1, 128, 384>}, {transform_indices = @transform_2, window_bounds = array<i64: 1, 128, 128>}, {transform_indices = @transform_3, window_bounds = array<i64: 1, 128, 512>}, {transform_indices = @transform_4, window_bounds = array<i64: 1, 512, 128>}, {transform_indices = @transform_5, window_bounds = array<i64: 1, 9, 128>}, {transform_indices = @transform_6, window_bounds = array<i64: 1, 1, 512>}, {pipeline_mode = #tpu.pipeline_mode<synchronous>, transform_indices = @transform_7, window_bounds = array<i64: 2, 128>}, {transform_indices = @transform_8, window_bounds = array<i64: 16, 128>}]} {
    %c0_i32 = arith.constant 0 : i32
    %0 = arith.cmpi eq, %arg1, %c0_i32 : i32
    %1 = arith.extui %0 : i1 to i32
    %c0_i32_0 = arith.constant 0 : i32
    %2 = arith.cmpi ne, %1, %c0_i32_0 : i32
    scf.if %2 {
      %c0_63 = arith.constant 0 : index
      %c0_64 = arith.constant 0 : index
      %212 = vector.load %arg2[%c0_63, %c0_64] : memref<16x128xf32, #tpu.memory_space<vmem>>, vector<16x128xf32>
      %c0_65 = arith.constant 0 : index
      %c0_66 = arith.constant 0 : index
      %213 = vector.load %arg11[%c0_65, %c0_66] : memref<16x128xf32, #tpu.memory_space<vmem>>, vector<16x128xf32>
      tpu.vector_store %arg11[%c0_65, %c0_66], %212 {strides = array<i32>} : memref<16x128xf32, #tpu.memory_space<vmem>>, vector<16x128xf32>,
    } else {
    }
    %c0 = arith.constant 0 : index
    %c0_1 = arith.constant 0 : index
    %3 = vector.load %arg11[%c0, %c0_1] : memref<16x128xf32, #tpu.memory_space<vmem>>, vector<16x128xf32>
    %c0_2 = arith.constant 0 : index
    %c0_3 = arith.constant 0 : index
    %c0_4 = arith.constant 0 : index
    %4 = vector.load %arg7[%c0_2, %c0_3, %c0_4] : memref<1x9x128xf32, #tpu.memory_space<vmem>>, vector<1x9x128xf32>
    %5 = vector.shape_cast %4 : vector<1x9x128xf32> to vector<9x128xf32>
    %6 = vector.extract_strided_slice %5 {offsets = [0, 0], sizes = [1, 128], strides = [1, 1]} : vector<9x128xf32> to vector<1x128xf32>
    %7 = vector.extract_strided_slice %5 {offsets = [1, 0], sizes = [1, 128], strides = [1, 1]} : vector<9x128xf32> to vector<1x128xf32>
    %8 = vector.extract_strided_slice %5 {offsets = [2, 0], sizes = [1, 128], strides = [1, 1]} : vector<9x128xf32> to vector<1x128xf32>
    %9 = vector.extract_strided_slice %5 {offsets = [3, 0], sizes = [1, 128], strides = [1, 1]} : vector<9x128xf32> to vector<1x128xf32>
    %10 = vector.extract_strided_slice %5 {offsets = [4, 0], sizes = [1, 128], strides = [1, 1]} : vector<9x128xf32> to vector<1x128xf32>
    %11 = vector.extract_strided_slice %5 {offsets = [5, 0], sizes = [1, 128], strides = [1, 1]} : vector<9x128xf32> to vector<1x128xf32>
    %12 = vector.extract_strided_slice %5 {offsets = [6, 0], sizes = [1, 128], strides = [1, 1]} : vector<9x128xf32> to vector<1x128xf32>
    %13 = vector.extract_strided_slice %5 {offsets = [7, 0], sizes = [1, 128], strides = [1, 1]} : vector<9x128xf32> to vector<1x128xf32>
    %14 = vector.extract_strided_slice %5 {offsets = [8, 0], sizes = [1, 128], strides = [1, 1]} : vector<9x128xf32> to vector<1x128xf32>
    %15 = tpu.iota {dimensions = array<i32: 0>} : vector<16x16xi32>
    %16 = tpu.iota {dimensions = array<i32: 1>} : vector<16x16xi32>
    %17 = arith.cmpi sle, %16, %15 : vector<16x16xi32>
    %false = arith.constant false
    %18 = vector.broadcast %false : i1 to vector<16x16xi1>
    %c0_i32_5 = arith.constant 0 : i32
    %19 = vector.broadcast %c0_i32_5 : i32 to vector<16x16xi32>
    %20 = arith.cmpi sge, %15, %19 : vector<16x16xi32>
    %c8_i32 = arith.constant 8 : i32
    %21 = vector.broadcast %c8_i32 : i32 to vector<16x16xi32>
    %22 = arith.cmpi slt, %15, %21 : vector<16x16xi32>
    %23 = arith.andi %20, %22 : vector<16x16xi1>
    %c0_i32_6 = arith.constant 0 : i32
    %24 = vector.broadcast %c0_i32_6 : i32 to vector<16x16xi32>
    %25 = arith.cmpi sge, %16, %24 : vector<16x16xi32>
    %c8_i32_7 = arith.constant 8 : i32
    %26 = vector.broadcast %c8_i32_7 : i32 to vector<16x16xi32>
    %27 = arith.cmpi slt, %16, %26 : vector<16x16xi32>
    %28 = arith.andi %25, %27 : vector<16x16xi1>
    %29 = arith.andi %23, %28 : vector<16x16xi1>
    %30 = arith.ori %18, %29 : vector<16x16xi1>
    %c8_i32_8 = arith.constant 8 : i32
    %31 = vector.broadcast %c8_i32_8 : i32 to vector<16x16xi32>
    %32 = arith.cmpi sge, %15, %31 : vector<16x16xi32>
    %c16_i32 = arith.constant 16 : i32
    %33 = vector.broadcast %c16_i32 : i32 to vector<16x16xi32>
    %34 = arith.cmpi slt, %15, %33 : vector<16x16xi32>
    %35 = arith.andi %32, %34 : vector<16x16xi1>
    %c8_i32_9 = arith.constant 8 : i32
    %36 = vector.broadcast %c8_i32_9 : i32 to vector<16x16xi32>
    %37 = arith.cmpi sge, %16, %36 : vector<16x16xi32>
    %c16_i32_10 = arith.constant 16 : i32
    %38 = vector.broadcast %c16_i32_10 : i32 to vector<16x16xi32>
    %39 = arith.cmpi slt, %16, %38 : vector<16x16xi32>
    %40 = arith.andi %37, %39 : vector<16x16xi1>
    %41 = arith.andi %35, %40 : vector<16x16xi1>
    %42 = arith.ori %30, %41 : vector<16x16xi1>
    %43 = arith.andi %17, %42 : vector<16x16xi1>
    %cst = arith.constant 0.000000e+00 : f32
    %cst_11 = arith.constant -1.000000e+09 : f32
    %44 = vector.broadcast %cst : f32 to vector<16x16xf32>
    %45 = vector.broadcast %cst_11 : f32 to vector<16x16xf32>
    %46 = arith.select %43, %44, %45 : vector<16x16xi1>, vector<16x16xf32>
    %cst_12 = arith.constant dense<0.000000e+00> : vector<16xf32>
    %47 = vector.multi_reduction <add>, %3, %cst_12 [1] : vector<16x128xf32> to vector<16xf32>
    %48 = vector.shape_cast %47 : vector<16xf32> to vector<16x1xf32>
    %cst_13 = arith.constant 1.280000e+02 : f32
    %49 = vector.broadcast %cst_13 : f32 to vector<16x1xf32>
    %50 = arith.divf %48, %49 : vector<16x1xf32>
    %51 = vector.broadcast %50 : vector<16x1xf32> to vector<16x128xf32>
    %52 = arith.subf %3, %51 : vector<16x128xf32>
    %53 = arith.mulf %52, %52 : vector<16x128xf32>
    %cst_14 = arith.constant dense<0.000000e+00> : vector<16xf32>
    %54 = vector.multi_reduction <add>, %53, %cst_14 [1] : vector<16x128xf32> to vector<16xf32>
    %55 = vector.shape_cast %54 : vector<16xf32> to vector<16x1xf32>
    %cst_15 = arith.constant 1.280000e+02 : f32
    %56 = vector.broadcast %cst_15 : f32 to vector<16x1xf32>
    %57 = arith.divf %55, %56 : vector<16x1xf32>
    %58 = vector.broadcast %50 : vector<16x1xf32> to vector<16x128xf32>
    %59 = arith.subf %3, %58 : vector<16x128xf32>
    %cst_16 = arith.constant 9.99999974E-6 : f32
    %60 = vector.broadcast %cst_16 : f32 to vector<16x1xf32>
    %61 = arith.addf %57, %60 : vector<16x1xf32>
    %62 = math.rsqrt %61 : vector<16x1xf32>
    %63 = vector.broadcast %62 : vector<16x1xf32> to vector<16x128xf32>
    %64 = arith.mulf %59, %63 : vector<16x128xf32>
    %65 = vector.broadcast %6 : vector<1x128xf32> to vector<16x128xf32>
    %66 = arith.mulf %64, %65 : vector<16x128xf32>
    %67 = vector.broadcast %7 : vector<1x128xf32> to vector<16x128xf32>
    %68 = arith.addf %66, %67 : vector<16x128xf32>
    %69 = arith.truncf %68 : vector<16x128xf32> to vector<16x128xbf16>
    %c0_17 = arith.constant 0 : index
    %c0_18 = arith.constant 0 : index
    %c0_19 = arith.constant 0 : index
    %70 = vector.load %arg3[%c0_17, %c0_18, %c0_19] : memref<1x128x384xbf16, #tpu.memory_space<vmem>>, vector<1x128x384xbf16>
    %71 = vector.shape_cast %70 : vector<1x128x384xbf16> to vector<128x384xbf16>
    %cst_20 = arith.constant dense<0.000000e+00> : vector<16x384xf32>
    %72 = tpu.matmul %69, %71, %cst_20 {dimension_numbers = #tpu.dot_dimension_numbers<[1], [0], [0], [1], [0, 0, 1, 1], [], []>} : vector<16x128xbf16>, vector<128x384xbf16>, vector<16x384xf32> -> vector<16x384xf32>
    %73 = vector.extract_strided_slice %72 {offsets = [0, 0], sizes = [16, 128], strides = [1, 1]} : vector<16x384xf32> to vector<16x128xf32>
    %74 = vector.broadcast %8 : vector<1x128xf32> to vector<16x128xf32>
    %75 = arith.addf %73, %74 : vector<16x128xf32>
    %cst_21 = arith.constant 0.176776692 : f32
    %76 = vector.broadcast %cst_21 : f32 to vector<16x128xf32>
    %77 = arith.mulf %75, %76 : vector<16x128xf32>
    %78 = arith.truncf %77 : vector<16x128xf32> to vector<16x128xbf16>
    %79 = vector.extract_strided_slice %72 {offsets = [0, 128], sizes = [16, 128], strides = [1, 1]} : vector<16x384xf32> to vector<16x128xf32>
    %80 = vector.broadcast %9 : vector<1x128xf32> to vector<16x128xf32>
    %81 = arith.addf %79, %80 : vector<16x128xf32>
    %82 = arith.truncf %81 : vector<16x128xf32> to vector<16x128xbf16>
    %83 = vector.extract_strided_slice %72 {offsets = [0, 256], sizes = [16, 128], strides = [1, 1]} : vector<16x384xf32> to vector<16x128xf32>
    %84 = vector.broadcast %10 : vector<1x128xf32> to vector<16x128xf32>
    %85 = arith.addf %83, %84 : vector<16x128xf32>
    %86 = arith.truncf %85 : vector<16x128xf32> to vector<16x128xbf16>
    %87 = vector.extract_strided_slice %78 {offsets = [0, 0], sizes = [16, 32], strides = [1, 1]} : vector<16x128xbf16> to vector<16x32xbf16>
    %88 = vector.extract_strided_slice %82 {offsets = [0, 0], sizes = [16, 32], strides = [1, 1]} : vector<16x128xbf16> to vector<16x32xbf16>
    %cst_22 = arith.constant dense<0.000000e+00> : vector<16x16xf32>
    %89 = tpu.matmul %87, %88, %cst_22 {dimension_numbers = #tpu.dot_dimension_numbers<[1], [1], [0], [0], [0, 0, 1, 0], [], []>} : vector<16x32xbf16>, vector<16x32xbf16>, vector<16x16xf32> -> vector<16x16xf32>
    %90 = arith.addf %89, %46 : vector<16x16xf32>
    %cst_23 = arith.constant dense<0xFF800000> : vector<16xf32>
    %91 = vector.multi_reduction <maximumf>, %90, %cst_23 [1] : vector<16x16xf32> to vector<16xf32>
    %92 = vector.shape_cast %91 : vector<16xf32> to vector<16x1xf32>
    %93 = vector.broadcast %92 : vector<16x1xf32> to vector<16x16xf32>
    %94 = arith.subf %90, %93 : vector<16x16xf32>
    %95 = math.exp %94 : vector<16x16xf32>
    %cst_24 = arith.constant dense<0.000000e+00> : vector<16xf32>
    %96 = vector.multi_reduction <add>, %95, %cst_24 [1] : vector<16x16xf32> to vector<16xf32>
    %97 = vector.shape_cast %96 : vector<16xf32> to vector<16x1xf32>
    %98 = tpu.reciprocal %97 {approx = true} : vector<16x1xf32> -> vector<16x1xf32>
    %99 = vector.broadcast %98 : vector<16x1xf32> to vector<16x16xf32>
    %100 = arith.mulf %95, %99 : vector<16x16xf32>
    %101 = arith.truncf %100 : vector<16x16xf32> to vector<16x16xbf16>
    %102 = vector.extract_strided_slice %86 {offsets = [0, 0], sizes = [16, 32], strides = [1, 1]} : vector<16x128xbf16> to vector<16x32xbf16>
    %cst_25 = arith.constant dense<0.000000e+00> : vector<16x32xf32>
    %103 = tpu.matmul %101, %102, %cst_25 {dimension_numbers = #tpu.dot_dimension_numbers<[1], [0], [0], [1], [0, 0, 1, 1], [], []>} : vector<16x16xbf16>, vector<16x32xbf16>, vector<16x32xf32> -> vector<16x32xf32>
    %104 = vector.extract_strided_slice %78 {offsets = [0, 32], sizes = [16, 32], strides = [1, 1]} : vector<16x128xbf16> to vector<16x32xbf16>
    %105 = vector.extract_strided_slice %82 {offsets = [0, 32], sizes = [16, 32], strides = [1, 1]} : vector<16x128xbf16> to vector<16x32xbf16>
    %cst_26 = arith.constant dense<0.000000e+00> : vector<16x16xf32>
    %106 = tpu.matmul %104, %105, %cst_26 {dimension_numbers = #tpu.dot_dimension_numbers<[1], [1], [0], [0], [0, 0, 1, 0], [], []>} : vector<16x32xbf16>, vector<16x32xbf16>, vector<16x16xf32> -> vector<16x16xf32>
    %107 = arith.addf %106, %46 : vector<16x16xf32>
    %cst_27 = arith.constant dense<0xFF800000> : vector<16xf32>
    %108 = vector.multi_reduction <maximumf>, %107, %cst_27 [1] : vector<16x16xf32> to vector<16xf32>
    %109 = vector.shape_cast %108 : vector<16xf32> to vector<16x1xf32>
    %110 = vector.broadcast %109 : vector<16x1xf32> to vector<16x16xf32>
    %111 = arith.subf %107, %110 : vector<16x16xf32>
    %112 = math.exp %111 : vector<16x16xf32>
    %cst_28 = arith.constant dense<0.000000e+00> : vector<16xf32>
    %113 = vector.multi_reduction <add>, %112, %cst_28 [1] : vector<16x16xf32> to vector<16xf32>
    %114 = vector.shape_cast %113 : vector<16xf32> to vector<16x1xf32>
    %115 = tpu.reciprocal %114 {approx = true} : vector<16x1xf32> -> vector<16x1xf32>
    %116 = vector.broadcast %115 : vector<16x1xf32> to vector<16x16xf32>
    %117 = arith.mulf %112, %116 : vector<16x16xf32>
    %118 = arith.truncf %117 : vector<16x16xf32> to vector<16x16xbf16>
    %119 = vector.extract_strided_slice %86 {offsets = [0, 32], sizes = [16, 32], strides = [1, 1]} : vector<16x128xbf16> to vector<16x32xbf16>
    %cst_29 = arith.constant dense<0.000000e+00> : vector<16x32xf32>
    %120 = tpu.matmul %118, %119, %cst_29 {dimension_numbers = #tpu.dot_dimension_numbers<[1], [0], [0], [1], [0, 0, 1, 1], [], []>} : vector<16x16xbf16>, vector<16x32xbf16>, vector<16x32xf32> -> vector<16x32xf32>
    %121 = vector.extract_strided_slice %78 {offsets = [0, 64], sizes = [16, 32], strides = [1, 1]} : vector<16x128xbf16> to vector<16x32xbf16>
    %122 = vector.extract_strided_slice %82 {offsets = [0, 64], sizes = [16, 32], strides = [1, 1]} : vector<16x128xbf16> to vector<16x32xbf16>
    %cst_30 = arith.constant dense<0.000000e+00> : vector<16x16xf32>
    %123 = tpu.matmul %121, %122, %cst_30 {dimension_numbers = #tpu.dot_dimension_numbers<[1], [1], [0], [0], [0, 0, 1, 0], [], []>} : vector<16x32xbf16>, vector<16x32xbf16>, vector<16x16xf32> -> vector<16x16xf32>
    %124 = arith.addf %123, %46 : vector<16x16xf32>
    %cst_31 = arith.constant dense<0xFF800000> : vector<16xf32>
    %125 = vector.multi_reduction <maximumf>, %124, %cst_31 [1] : vector<16x16xf32> to vector<16xf32>
    %126 = vector.shape_cast %125 : vector<16xf32> to vector<16x1xf32>
    %127 = vector.broadcast %126 : vector<16x1xf32> to vector<16x16xf32>
    %128 = arith.subf %124, %127 : vector<16x16xf32>
    %129 = math.exp %128 : vector<16x16xf32>
    %cst_32 = arith.constant dense<0.000000e+00> : vector<16xf32>
    %130 = vector.multi_reduction <add>, %129, %cst_32 [1] : vector<16x16xf32> to vector<16xf32>
    %131 = vector.shape_cast %130 : vector<16xf32> to vector<16x1xf32>
    %132 = tpu.reciprocal %131 {approx = true} : vector<16x1xf32> -> vector<16x1xf32>
    %133 = vector.broadcast %132 : vector<16x1xf32> to vector<16x16xf32>
    %134 = arith.mulf %129, %133 : vector<16x16xf32>
    %135 = arith.truncf %134 : vector<16x16xf32> to vector<16x16xbf16>
    %136 = vector.extract_strided_slice %86 {offsets = [0, 64], sizes = [16, 32], strides = [1, 1]} : vector<16x128xbf16> to vector<16x32xbf16>
    %cst_33 = arith.constant dense<0.000000e+00> : vector<16x32xf32>
    %137 = tpu.matmul %135, %136, %cst_33 {dimension_numbers = #tpu.dot_dimension_numbers<[1], [0], [0], [1], [0, 0, 1, 1], [], []>} : vector<16x16xbf16>, vector<16x32xbf16>, vector<16x32xf32> -> vector<16x32xf32>
    %138 = vector.extract_strided_slice %78 {offsets = [0, 96], sizes = [16, 32], strides = [1, 1]} : vector<16x128xbf16> to vector<16x32xbf16>
    %139 = vector.extract_strided_slice %82 {offsets = [0, 96], sizes = [16, 32], strides = [1, 1]} : vector<16x128xbf16> to vector<16x32xbf16>
    %cst_34 = arith.constant dense<0.000000e+00> : vector<16x16xf32>
    %140 = tpu.matmul %138, %139, %cst_34 {dimension_numbers = #tpu.dot_dimension_numbers<[1], [1], [0], [0], [0, 0, 1, 0], [], []>} : vector<16x32xbf16>, vector<16x32xbf16>, vector<16x16xf32> -> vector<16x16xf32>
    %141 = arith.addf %140, %46 : vector<16x16xf32>
    %cst_35 = arith.constant dense<0xFF800000> : vector<16xf32>
    %142 = vector.multi_reduction <maximumf>, %141, %cst_35 [1] : vector<16x16xf32> to vector<16xf32>
    %143 = vector.shape_cast %142 : vector<16xf32> to vector<16x1xf32>
    %144 = vector.broadcast %143 : vector<16x1xf32> to vector<16x16xf32>
    %145 = arith.subf %141, %144 : vector<16x16xf32>
    %146 = math.exp %145 : vector<16x16xf32>
    %cst_36 = arith.constant dense<0.000000e+00> : vector<16xf32>
    %147 = vector.multi_reduction <add>, %146, %cst_36 [1] : vector<16x16xf32> to vector<16xf32>
    %148 = vector.shape_cast %147 : vector<16xf32> to vector<16x1xf32>
    %149 = tpu.reciprocal %148 {approx = true} : vector<16x1xf32> -> vector<16x1xf32>
    %150 = vector.broadcast %149 : vector<16x1xf32> to vector<16x16xf32>
    %151 = arith.mulf %146, %150 : vector<16x16xf32>
    %152 = arith.truncf %151 : vector<16x16xf32> to vector<16x16xbf16>
    %153 = vector.extract_strided_slice %86 {offsets = [0, 96], sizes = [16, 32], strides = [1, 1]} : vector<16x128xbf16> to vector<16x32xbf16>
    %cst_37 = arith.constant dense<0.000000e+00> : vector<16x32xf32>
    %154 = tpu.matmul %152, %153, %cst_37 {dimension_numbers = #tpu.dot_dimension_numbers<[1], [0], [0], [1], [0, 0, 1, 1], [], []>} : vector<16x16xbf16>, vector<16x32xbf16>, vector<16x32xf32> -> vector<16x32xf32>
    %155 = tpu.concatenate %103, %120, %137, %154 in 1 : vector<16x32xf32>, vector<16x32xf32>, vector<16x32xf32>, vector<16x32xf32> -> vector<16x128xf32>
    %156 = arith.truncf %155 : vector<16x128xf32> to vector<16x128xbf16>
    %c0_38 = arith.constant 0 : index
    %c0_39 = arith.constant 0 : index
    %c0_40 = arith.constant 0 : index
    %157 = vector.load %arg4[%c0_38, %c0_39, %c0_40] : memref<1x128x128xbf16, #tpu.memory_space<vmem>>, vector<1x128x128xbf16>
    %158 = vector.shape_cast %157 : vector<1x128x128xbf16> to vector<128x128xbf16>
    %cst_41 = arith.constant dense<0.000000e+00> : vector<16x128xf32>
    %159 = tpu.matmul %156, %158, %cst_41 {dimension_numbers = #tpu.dot_dimension_numbers<[1], [0], [0], [1], [0, 0, 1, 1], [], []>} : vector<16x128xbf16>, vector<128x128xbf16>, vector<16x128xf32> -> vector<16x128xf32>
    %160 = arith.addf %3, %159 : vector<16x128xf32>
    %161 = vector.broadcast %11 : vector<1x128xf32> to vector<16x128xf32>
    %162 = arith.addf %160, %161 : vector<16x128xf32>
    %cst_42 = arith.constant dense<0.000000e+00> : vector<16xf32>
    %163 = vector.multi_reduction <add>, %162, %cst_42 [1] : vector<16x128xf32> to vector<16xf32>
    %164 = vector.shape_cast %163 : vector<16xf32> to vector<16x1xf32>
    %cst_43 = arith.constant 1.280000e+02 : f32
    %165 = vector.broadcast %cst_43 : f32 to vector<16x1xf32>
    %166 = arith.divf %164, %165 : vector<16x1xf32>
    %167 = vector.broadcast %166 : vector<16x1xf32> to vector<16x128xf32>
    %168 = arith.subf %162, %167 : vector<16x128xf32>
    %169 = arith.mulf %168, %168 : vector<16x128xf32>
    %cst_44 = arith.constant dense<0.000000e+00> : vector<16xf32>
    %170 = vector.multi_reduction <add>, %169, %cst_44 [1] : vector<16x128xf32> to vector<16xf32>
    %171 = vector.shape_cast %170 : vector<16xf32> to vector<16x1xf32>
    %cst_45 = arith.constant 1.280000e+02 : f32
    %172 = vector.broadcast %cst_45 : f32 to vector<16x1xf32>
    %173 = arith.divf %171, %172 : vector<16x1xf32>
    %174 = vector.broadcast %166 : vector<16x1xf32> to vector<16x128xf32>
    %175 = arith.subf %162, %174 : vector<16x128xf32>
    %cst_46 = arith.constant 9.99999974E-6 : f32
    %176 = vector.broadcast %cst_46 : f32 to vector<16x1xf32>
    %177 = arith.addf %173, %176 : vector<16x1xf32>
    %178 = math.rsqrt %177 : vector<16x1xf32>
    %179 = vector.broadcast %178 : vector<16x1xf32> to vector<16x128xf32>
    %180 = arith.mulf %175, %179 : vector<16x128xf32>
    %181 = vector.broadcast %12 : vector<1x128xf32> to vector<16x128xf32>
    %182 = arith.mulf %180, %181 : vector<16x128xf32>
    %183 = vector.broadcast %13 : vector<1x128xf32> to vector<16x128xf32>
    %184 = arith.addf %182, %183 : vector<16x128xf32>
    %185 = arith.truncf %184 : vector<16x128xf32> to vector<16x128xbf16>
    %c0_47 = arith.constant 0 : index
    %c0_48 = arith.constant 0 : index
    %c0_49 = arith.constant 0 : index
    %186 = vector.load %arg5[%c0_47, %c0_48, %c0_49] : memref<1x128x512xbf16, #tpu.memory_space<vmem>>, vector<1x128x512xbf16>
    %187 = vector.shape_cast %186 : vector<1x128x512xbf16> to vector<128x512xbf16>
    %cst_50 = arith.constant dense<0.000000e+00> : vector<16x512xf32>
    %188 = tpu.matmul %185, %187, %cst_50 {dimension_numbers = #tpu.dot_dimension_numbers<[1], [0], [0], [1], [0, 0, 1, 1], [], []>} : vector<16x128xbf16>, vector<128x512xbf16>, vector<16x512xf32> -> vector<16x512xf32>
    %c0_51 = arith.constant 0 : index
    %c0_52 = arith.constant 0 : index
    %c0_53 = arith.constant 0 : index
    %189 = vector.load %arg8[%c0_51, %c0_52, %c0_53] : memref<1x1x512xf32, #tpu.memory_space<vmem>>, vector<1x1x512xf32>
    %190 = vector.shape_cast %189 : vector<1x1x512xf32> to vector<1x512xf32>
    %191 = vector.broadcast %190 : vector<1x512xf32> to vector<16x512xf32>
    %192 = arith.addf %188, %191 : vector<16x512xf32>
    %cst_54 = arith.constant 1.702000e+00 : f32
    %193 = vector.broadcast %cst_54 : f32 to vector<16x512xf32>
    %194 = arith.mulf %193, %192 : vector<16x512xf32>
    %195 = arith.negf %194 : vector<16x512xf32>
    %196 = math.exp %195 : vector<16x512xf32>
    %cst_55 = arith.constant 1.000000e+00 : f32
    %197 = vector.broadcast %cst_55 : f32 to vector<16x512xf32>
    %198 = arith.addf %197, %196 : vector<16x512xf32>
    %199 = arith.divf %197, %198 : vector<16x512xf32>
    %200 = arith.mulf %192, %199 : vector<16x512xf32>
    %201 = arith.truncf %200 : vector<16x512xf32> to vector<16x512xbf16>
    %c0_56 = arith.constant 0 : index
    %c0_57 = arith.constant 0 : index
    %c0_58 = arith.constant 0 : index
    %202 = vector.load %arg6[%c0_56, %c0_57, %c0_58] : memref<1x512x128xbf16, #tpu.memory_space<vmem>>, vector<1x512x128xbf16>
    %203 = vector.shape_cast %202 : vector<1x512x128xbf16> to vector<512x128xbf16>
    %cst_59 = arith.constant dense<0.000000e+00> : vector<16x128xf32>
    %204 = tpu.matmul %201, %203, %cst_59 {dimension_numbers = #tpu.dot_dimension_numbers<[1], [0], [0], [1], [0, 0, 1, 1], [], []>} : vector<16x512xbf16>, vector<512x128xbf16>, vector<16x128xf32> -> vector<16x128xf32>
    %205 = arith.addf %162, %204 : vector<16x128xf32>
    %206 = vector.broadcast %14 : vector<1x128xf32> to vector<16x128xf32>
    %207 = arith.addf %205, %206 : vector<16x128xf32>
    %c0_60 = arith.constant 0 : index
    %c0_61 = arith.constant 0 : index
    %208 = vector.load %arg11[%c0_60, %c0_61] : memref<16x128xf32, #tpu.memory_space<vmem>>, vector<16x128xf32>
    tpu.vector_store %arg11[%c0_60, %c0_61], %207 {strides = array<i32>} : memref<16x128xf32, #tpu.memory_space<vmem>>, vector<16x128xf32>,
    %c1_i32 = arith.constant 1 : i32
    %209 = arith.cmpi eq, %arg1, %c1_i32 : i32
    %210 = arith.extui %209 : i1 to i32
    %c0_i32_62 = arith.constant 0 : i32
    %211 = arith.cmpi ne, %210, %c0_i32_62 : i32
    scf.if %211 {
      %c0_63 = arith.constant 0 : index
      %c0_64 = arith.constant 0 : index
      %212 = vector.load %arg9[%c0_63, %c0_64] : memref<2x128xf32, #tpu.memory_space<vmem>>, vector<2x128xf32>
      %213 = vector.extract_strided_slice %212 {offsets = [0, 0], sizes = [1, 128], strides = [1, 1]} : vector<2x128xf32> to vector<1x128xf32>
      %214 = vector.extract_strided_slice %212 {offsets = [1, 0], sizes = [1, 128], strides = [1, 1]} : vector<2x128xf32> to vector<1x128xf32>
      %cst_65 = arith.constant dense<0.000000e+00> : vector<16xf32>
      %215 = vector.multi_reduction <add>, %207, %cst_65 [1] : vector<16x128xf32> to vector<16xf32>
      %216 = vector.shape_cast %215 : vector<16xf32> to vector<16x1xf32>
      %cst_66 = arith.constant 1.280000e+02 : f32
      %217 = vector.broadcast %cst_66 : f32 to vector<16x1xf32>
      %218 = arith.divf %216, %217 : vector<16x1xf32>
      %219 = vector.broadcast %218 : vector<16x1xf32> to vector<16x128xf32>
      %220 = arith.subf %207, %219 : vector<16x128xf32>
      %221 = arith.mulf %220, %220 : vector<16x128xf32>
      %cst_67 = arith.constant dense<0.000000e+00> : vector<16xf32>
      %222 = vector.multi_reduction <add>, %221, %cst_67 [1] : vector<16x128xf32> to vector<16xf32>
      %223 = vector.shape_cast %222 : vector<16xf32> to vector<16x1xf32>
      %cst_68 = arith.constant 1.280000e+02 : f32
      %224 = vector.broadcast %cst_68 : f32 to vector<16x1xf32>
      %225 = arith.divf %223, %224 : vector<16x1xf32>
      %226 = vector.broadcast %218 : vector<16x1xf32> to vector<16x128xf32>
      %227 = arith.subf %207, %226 : vector<16x128xf32>
      %cst_69 = arith.constant 9.99999974E-6 : f32
      %228 = vector.broadcast %cst_69 : f32 to vector<16x1xf32>
      %229 = arith.addf %225, %228 : vector<16x1xf32>
      %230 = math.rsqrt %229 : vector<16x1xf32>
      %231 = vector.broadcast %230 : vector<16x1xf32> to vector<16x128xf32>
      %232 = arith.mulf %227, %231 : vector<16x128xf32>
      %233 = vector.broadcast %213 : vector<1x128xf32> to vector<16x128xf32>
      %234 = arith.mulf %232, %233 : vector<16x128xf32>
      %235 = vector.broadcast %214 : vector<1x128xf32> to vector<16x128xf32>
      %236 = arith.addf %234, %235 : vector<16x128xf32>
      %c0_70 = arith.constant 0 : index
      %c0_71 = arith.constant 0 : index
      %237 = vector.load %arg10[%c0_70, %c0_71] : memref<16x128xf32, #tpu.memory_space<vmem>>, vector<16x128xf32>
      tpu.vector_store %arg10[%c0_70, %c0_71], %236 {strides = array<i32>} : memref<16x128xf32, #tpu.memory_space<vmem>>, vector<16x128xf32>,
    } else {
    }
    return
  }
  func.func @transform_0(%arg0: i32, %arg1: i32) -> (i32, i32) {
    %c0_i32 = arith.constant 0 : i32
    %c0_i32_0 = arith.constant 0 : i32
    return %arg0, %c0_i32 : i32, i32
  }
  func.func @transform_1(%arg0: i32, %arg1: i32) -> (i32, i32, i32) {
    %c0_i32 = arith.constant 0 : i32
    %c0_i32_0 = arith.constant 0 : i32
    %c0_i32_1 = arith.constant 0 : i32
    return %arg1, %c0_i32, %c0_i32_0 : i32, i32, i32
  }
  func.func @transform_2(%arg0: i32, %arg1: i32) -> (i32, i32, i32) {
    %c0_i32 = arith.constant 0 : i32
    %c0_i32_0 = arith.constant 0 : i32
    %c0_i32_1 = arith.constant 0 : i32
    return %arg1, %c0_i32, %c0_i32_0 : i32, i32, i32
  }
  func.func @transform_3(%arg0: i32, %arg1: i32) -> (i32, i32, i32) {
    %c0_i32 = arith.constant 0 : i32
    %c0_i32_0 = arith.constant 0 : i32
    %c0_i32_1 = arith.constant 0 : i32
    return %arg1, %c0_i32, %c0_i32_0 : i32, i32, i32
  }
  func.func @transform_4(%arg0: i32, %arg1: i32) -> (i32, i32, i32) {
    %c0_i32 = arith.constant 0 : i32
    %c0_i32_0 = arith.constant 0 : i32
    %c0_i32_1 = arith.constant 0 : i32
    return %arg1, %c0_i32, %c0_i32_0 : i32, i32, i32
  }
  func.func @transform_5(%arg0: i32, %arg1: i32) -> (i32, i32, i32) {
    %c0_i32 = arith.constant 0 : i32
    %c0_i32_0 = arith.constant 0 : i32
    %c0_i32_1 = arith.constant 0 : i32
    return %arg1, %c0_i32, %c0_i32_0 : i32, i32, i32
  }
  func.func @transform_6(%arg0: i32, %arg1: i32) -> (i32, i32, i32) {
    %c0_i32 = arith.constant 0 : i32
    %c0_i32_0 = arith.constant 0 : i32
    %c0_i32_1 = arith.constant 0 : i32
    return %arg1, %c0_i32, %c0_i32_0 : i32, i32, i32
  }
  func.func @transform_7(%arg0: i32, %arg1: i32) -> (i32, i32) {
    %c0_i32 = arith.constant 0 : i32
    %c0_i32_0 = arith.constant 0 : i32
    %c0_i32_1 = arith.constant 0 : i32
    return %c0_i32, %c0_i32_0 : i32, i32
  }
  func.func @transform_8(%arg0: i32, %arg1: i32) -> (i32, i32) {
    %c0_i32 = arith.constant 0 : i32
    %c0_i32_0 = arith.constant 0 : i32
    return %arg0, %c0_i32 : i32, i32
  }
}

</mosaic_0001>

<bundles_post_ra>
// kernel: tpu_custom_call.1
= control target key start
LH: loop header
LB: loop body
LE: loop exit
PB: predicated region body
PF: predicated region fallthrough
CT: control target
= control target key end

     0   :  { %s3948_s0 = inlined_call_operand.vmem [shape: f32[16,128], index: 0, kind: input, shape index: {}]   ;;  %s3949_s1 = inlined_call_operand.hbm [shape: bf16[2,128,384], index: 1, kind: input, shape index: {}]   ;;  %s3950_s2 = inlined_call_operand.hbm [shape: bf16[2,128,128], index: 2, kind: input, shape index: {}]   ;;  %s3951_s3 = inlined_call_operand.hbm [shape: bf16[2,128,512], index: 3, kind: input, shape index: {}]   ;;  %s3952_s4 = inlined_call_operand.hbm [shape: bf16[2,512,128], index: 4, kind: input, shape index: {}]   ;;  %s3953_s5 = inlined_call_operand.vmem [shape: f32[2,9,128], index: 5, kind: input, shape index: {}]   ;;  %s3954_s6 = inlined_call_operand.vmem [shape: f32[2,1,512], index: 6, kind: input, shape index: {}]   ;;  %s3955_s7 = inlined_call_operand.vmem [shape: f32[2,128], index: 7, kind: input, shape index: {}]   ;;  %s3956_s8 = inlined_call_operand.hbm [shape: f32[16,128], index: 8, kind: output, shape index: {}]  }
   0x1   :  { %3962 = sst [smem:[#allocation19_spill]] %s3949_s1 }
   0x2   :  { %3963 = sst [smem:[#allocation20_spill]] %s3950_s2 }
   0x3   :  { %13 = vsyncpa [#allocation4], 0 }
   0x4   :  { %15 = vsyncpa [#allocation4 + $0x1], 0 }
   0x5   :  { %16 = vsyncpa [#allocation7], 0 }
   0x6   :  { %18 = vsyncpa [#allocation7 + $0x1], 0 }
   0x7   :  { %19 = vsyncpa [#allocation10], 0 }
   0x8   :  { %21 = vsyncpa [#allocation10 + $0x1], 0 }
   0x9   :  { %22 = vsyncpa [#allocation5], 0  ;;  %s3348_s27 = smov 0   ;;  %s3350_s28 = smov 0  }
   0xa   :  { %s3352_s29 = smov 0   ;;  %s3354_s30 = smov 0  }
   0xb   :  { %s3356_s9 = smov 0   ;;  %s3358_s10 = smov 0  }
   0xc LB: > { %3964 = sst [smem:[#allocation16_spill]] %s3269_s29  ;;  %s3377_s11 = sadd.s32 4294967295, %s3281_s10   ;;  %s3281_s10 = sphi %s3358_s10, %s28_s10   ;;  %s3277_s9 = sphi %s3356_s9, %s3984_s9   ;;  %s3273_s30 = sphi %s3354_s30, %s3983_s30   ;;  %s3269_s29 = sphi %s3352_s29, %s3979_s29   ;;  %s3265_s28 = sphi %s3350_s28, %s3982_s28   ;;  %s3261_s27 = sphi %s3348_s27, %s3981_s27  }
   0xd   : > { %s37_s12 = sadd.s32 1, %s3277_s9  ;;  %s73_s13 = sadd.s32 1, %s3269_s29 }
   0xe   : > { %p38_p0 = scmp.ge.s32.totalorder %s37_s12, 2  ;;  %p80_p1 = scmp.ne.s32.totalorder %s3269_s29, %s3265_s28 }
   0xf   : > { %p81_p2 = scmp.eq.s32.totalorder %s3281_s10, 0  ;;  %p86_p4 = scmp.ne.s32.totalorder %s3265_s28, %s3261_s27 }
  0x10   : > { %s3986_s12 = smov (%p38_p0, %s37_s12), 0  ;;  %p87_p5 = scmp.eq.s32.totalorder %s3377_s11, 0 }
  0x11   : > { %3965 = sst [smem:[#allocation17_spill]] %s3986_s12  ;;  %p82_p3 = por %p81_p2, %p80_p1 }
  0x12   : > { %s70_s14 = ssub.s32 %s3277_s9, %s3986_s12  ;;  %p3390_p7 = por %p87_p5, %p86_p4 }
  0x13   : > { %p71_p6 = scmp.eq.s32.totalorder %s70_s14, 0  ;;  %p2793_p8 = scmp.lt.s32.totalorder %s3281_s10, 2 }
  0x14   : > { %s3966_s15 = scalar_select %p3390_p7, 1, 0 }
  0x15   : > { %s3396_s16 = scalar_select %p71_p6, %s3269_s29, %s73_s13  }
  0x16   : > { %s3399_s17 = sand.u32 1, %s3269_s29   ;;  %p3401_p9 = pnand %p2793_p8, %p82_p3 }
  0x17   : > { %3967 = sst [smem:[#allocation18_spill]] %s3396_s16  ;;  %s320_s19 = sand.u32 1, %s3281_s10  }
  0x18   : > { %s2460_s20 = sshll.u32 %s3399_s17, 6  ;;  %s2595_s21 = sshll.u32 %s3277_s9, 10 }
  0x19   : > { %s3969_s2 = sld [smem:[#allocation20_spill]]  ;;  %s324_s25 = scalar_lea.vmem [#allocation6], %s2460_s20 }
  0x1a   : > { %s331_s26 = sshll.u32 %s324_s25, 4  ;;  %s3416_s27 = scalar_lea.sflag [#allocation7], %s320_s19  ;;  %s3413_s26 = int_to_ptr.vmem [resolvable:$true] %s331_s26 }
  0x1b   : > { %p3422_p12 = pneg %p3401_p9 }
  0x1f   : > { %s3411_s24 = scalar_lea.hbm %s3969_s2, %s2595_s21  ;;  %s3078_s20 = scalar_lea.hbm %s3969_s2, 2048 }
  0x20   : > { %s3073_s13 = scalar_lea.hbm %s3411_s24, 1024  ;;  %p3079_p1 = scmp.lt.u32.totalorder %s3411_s24, %s3969_s2 }
  0x21   : > { %p3074_p11 = scmp.ne.s32.totalorder %s3411_s24, %s3073_s13  ;;  %p3080_p2 = scmp.lt.u32.totalorder %s3078_s20, %s3073_s13 }
  0x22   : > { %p3082_p4 = scmp.lt.u32.totalorder %s3073_s13, %s3411_s24 }
  0x23   : > { %p3076_p13 = pnand %p3422_p12, %p3074_p11  ;;  %p3081_p3 = por %p3080_p2, %p3079_p1 }
  0x25   : > { %p3077_p0 = pneg %p3076_p13  ;;  %p3083_p5 = por %p3082_p4, %p3081_p3 }
  0x27   : > { %p3084_p6 = pnand %p3083_p5, %p3077_p0 }
  0x29   : > { %3087 = shalt.err (!%p3084_p6)
}
  0x2a   : > { %s3088_s19 = scalar_lea.vmem %s3413_s26, 1024  ;;  %s3283_s21 = smov [#allocation6]  }
  0x2b   : > { %p3089_p8 = scmp.ne.s32.totalorder %s3413_s26, %s3088_s19  ;;  %s3093_s22 = sshll.u32 %s3283_s21, 4  ;;  %s3094_s22 = int_to_ptr.vmem [resolvable:$false] %s3093_s22 }
  0x2c   : > { %s3095_s23 = scalar_lea.vmem %s3094_s22, 2048  ;;  %p3096_p10 = scmp.lt.s32.totalorder %s3413_s26, %s3094_s22 }
  0x2d   : > { %p3091_p11 = pnand %p3089_p8, %p3422_p12  ;;  %p3097_p7 = scmp.lt.s32.totalorder %s3095_s23, %s3088_s19 }
  0x2f   : > { %p3092_p13 = pneg %p3091_p11  ;;  %p3098_p1 = por %p3097_p7, %p3096_p10 }
  0x31   : > { %p3099_p2 = pnand %p3098_p1, %p3092_p13 }
  0x33   : > { %3102 = shalt.err (!%p3099_p2)
}
  0x34   : > { %s3959_s13 = smov 64   ;;  %s3960_s20 = smov 4  }
  0x35   : > { %2786 = dma.hbm_to_vmem [thread:$0]  (!%p3401_p9), %s3411_s24, 1024, %s3413_s26, %s3416_s27, %s3959_s13, %s3959_s13, %s3960_s20  }
  0x36   : > { %p396_p7 = scmp.lt.s32.totalorder %s3281_s10, 3  ;;  %p3971_p10 = scmp.ge.s32.totalorder %s3281_s10, 1 }
  0x37   : > { %s2765_s19 = smul.u32 192, %s3399_s17  ;;  %s3973_s1 = sld [smem:[#allocation19_spill]] }
  0x38   : > { %p3452_p0 = pnand %p3971_p10, %p396_p7  ;;  %s2766_s21 = smul.u32 3072, %s3277_s9 }
  0x39   : > { %s303_s12 = scalar_lea.vmem [#allocation3], %s2765_s19  ;;  %s2463_s24 = sshll.u32 %s3399_s17, 8 }
  0x3a   : > { %s3972_s25 = scalar_select %p3452_p0, 1, 0 }
  0x3b   : > { %s310_s16 = sshll.u32 %s303_s12, 4  ;;  %s300_s26 = scalar_lea.sflag [#allocation4], %s3399_s17  ;;  %s3463_s16 = int_to_ptr.vmem [resolvable:$true] %s310_s16 }
  0x3d   : > { %s3461_s2 = scalar_lea.hbm %s3973_s1, %s2766_s21  ;;  %s3108_s21 = scalar_lea.hbm %s3973_s1, 6144 }
  0x3e   : > { %s3103_s13 = scalar_lea.hbm %s3461_s2, 3072  ;;  %p3109_p6 = scmp.lt.u32.totalorder %s3461_s2, %s3973_s1 }
  0x3f   : > { %p3104_p3 = scmp.ne.s32.totalorder %s3461_s2, %s3103_s13  ;;  %p3110_p8 = scmp.lt.u32.totalorder %s3108_s21, %s3103_s13 }
  0x40   : > { %p3112_p13 = scmp.lt.u32.totalorder %s3103_s13, %s3461_s2 }
  0x41   : > { %p3106_p4 = pnand %p3104_p3, %p3422_p12  ;;  %p3111_p11 = por %p3110_p8, %p3109_p6 }
  0x43   : > { %p3107_p5 = pneg %p3106_p4  ;;  %p3113_p1 = por %p3112_p13, %p3111_p11 }
  0x45   : > { %p3114_p2 = pnand %p3113_p1, %p3107_p5 }
  0x47   : > { %3117 = shalt.err (!%p3114_p2)
}
  0x48   : > { %s3118_s12 = scalar_lea.vmem %s3463_s16, 3072  ;;  %s3286_s29 = smov [#allocation3]  }
  0x49   : > { %p3119_p7 = scmp.ne.s32.totalorder %s3463_s16, %s3118_s12  ;;  %s3123_s20 = sshll.u32 %s3286_s29, 4  ;;  %s3124_s20 = int_to_ptr.vmem [resolvable:$false] %s3123_s20 }
  0x4a   : > { %s3125_s19 = scalar_lea.vmem %s3124_s20, 6144  ;;  %p3126_p4 = scmp.lt.s32.totalorder %s3463_s16, %s3124_s20 }
  0x4b   : > { %p3121_p10 = pnand %p3119_p7, %p3422_p12  ;;  %p3127_p0 = scmp.lt.s32.totalorder %s3125_s19, %s3118_s12 }
  0x4d   : > { %p3122_p3 = pneg %p3121_p10  ;;  %p3128_p6 = por %p3127_p0, %p3126_p4 }
  0x4f   : > { %p3129_p8 = pnand %p3128_p6, %p3122_p3 }
  0x51   : > { %3132 = shalt.err (!%p3129_p8)
}
  0x52   : > { %s3287_s13 = smov 192   ;;  %s3288_s21 = smov 12  }
  0x53   : > { %2783 = dma.hbm_to_vmem [thread:$0]  (!%p3401_p9), %s3461_s2, 3072, %s3463_s16, %s300_s26, %s3287_s13, %s3287_s13, %s3288_s21  }
  0x54   : > { %s2596_s22 = sshll.u32 %s3277_s9, 12  ;;  %s345_s20 = scalar_lea.vmem [#allocation8], %s2463_s24 }
  0x55   : > { %s3496_s29 = scalar_lea.hbm %s3951_s3, %s2596_s22  ;;  %s352_s19 = sshll.u32 %s345_s20, 4  ;;  %s3500_s19 = int_to_ptr.vmem [resolvable:$true] %s352_s19 }
  0x56   : > { %s3133_s1 = scalar_lea.hbm %s3496_s29, 4096  ;;  %s3138_s26 = scalar_lea.hbm %s3951_s3, 8192 }
  0x57   : > { %p3134_p0 = scmp.ne.s32.totalorder %s3496_s29, %s3133_s1  ;;  %p3139_p13 = scmp.lt.u32.totalorder %s3496_s29, %s3951_s3 }
  0x58   : > { %p3140_p1 = scmp.lt.u32.totalorder %s3138_s26, %s3133_s1  ;;  %p3142_p7 = scmp.lt.u32.totalorder %s3133_s1, %s3496_s29 }
  0x59   : > { %p3136_p5 = pnand %p3134_p0, %p3422_p12 }
  0x5a   : > { %p3141_p2 = por %p3140_p1, %p3139_p13 }
  0x5b   : > { %p3137_p11 = pneg %p3136_p5 }
  0x5c   : > { %p3143_p10 = por %p3142_p7, %p3141_p2 }
  0x5e   : > { %p3144_p3 = pnand %p3143_p10, %p3137_p11 }
  0x60   : > { %3147 = shalt.err (!%p3144_p3)
}
  0x61   : > { %s3148_s23 = scalar_lea.vmem %s3500_s19, 4096  ;;  %s3289_s12 = smov [#allocation8]  }
  0x62   : > { %p3149_p4 = scmp.ne.s32.totalorder %s3500_s19, %s3148_s23  ;;  %s3153_s20 = sshll.u32 %s3289_s12, 4  ;;  %s3154_s20 = int_to_ptr.vmem [resolvable:$false] %s3153_s20 }
  0x63   : > { %s3155_s2 = scalar_lea.vmem %s3154_s20, 8192  ;;  %p3156_p0 = scmp.lt.s32.totalorder %s3500_s19, %s3154_s20 }
  0x64   : > { %p3151_p6 = pnand %p3149_p4, %p3422_p12  ;;  %p3157_p5 = scmp.lt.s32.totalorder %s3155_s2, %s3148_s23 }
  0x66   : > { %p3152_p8 = pneg %p3151_p6  ;;  %p3158_p13 = por %p3157_p5, %p3156_p0 }
  0x68   : > { %p3159_p1 = pnand %p3158_p13, %p3152_p8 }
  0x6a   : > { %3162 = shalt.err (!%p3159_p1)
}
  0x6b   : > { %s3290_s1 = smov 256   ;;  %s3291_s16 = smov 16  }
  0x6c   : > { %2789 = dma.hbm_to_vmem [thread:$0]  (!%p3401_p9), %s3496_s29, 4096, %s3500_s19, %s3416_s27, %s3290_s1, %s3290_s1, %s3291_s16  }
  0x6d   : > { %s3529_s21 = scalar_lea.hbm %s3952_s4, %s2596_s22  ;;  %s366_s23 = scalar_lea.vmem [#allocation9], %s2463_s24 }
  0x6e   : > { %s373_s12 = sshll.u32 %s366_s23, 4  ;;  %s363_s20 = scalar_lea.sflag [#allocation10], %s3399_s17  ;;  %s3533_s12 = int_to_ptr.vmem [resolvable:$true] %s373_s12 }
  0x6f   : > { %s3163_s2 = scalar_lea.hbm %s3529_s21, 4096  ;;  %s3168_s22 = scalar_lea.hbm %s3952_s4, 8192 }
  0x70   : > { %p3164_p11 = scmp.ne.s32.totalorder %s3529_s21, %s3163_s2  ;;  %p3169_p10 = scmp.lt.u32.totalorder %s3529_s21, %s3952_s4 }
  0x71   : > { %p3170_p3 = scmp.lt.u32.totalorder %s3168_s22, %s3163_s2  ;;  %p3172_p6 = scmp.lt.u32.totalorder %s3163_s2, %s3529_s21 }
  0x72   : > { %p3166_p2 = pnand %p3164_p11, %p3422_p12 }
  0x73   : > { %p3171_p4 = por %p3170_p3, %p3169_p10 }
  0x74   : > { %p3167_p7 = pneg %p3166_p2 }
  0x75   : > { %p3173_p8 = por %p3172_p6, %p3171_p4 }
  0x77   : > { %p3174_p0 = pnand %p3173_p8, %p3167_p7 }
  0x79   : > { %3177 = shalt.err (!%p3174_p0)
}
  0x7a   : > { %s3178_s24 = scalar_lea.vmem %s3533_s12, 4096  ;;  %s3292_s16 = smov [#allocation9]  }
  0x7b   : > { %p3179_p5 = scmp.ne.s32.totalorder %s3533_s12, %s3178_s24  ;;  %s3183_s26 = sshll.u32 %s3292_s16, 4  ;;  %s3184_s26 = int_to_ptr.vmem [resolvable:$false] %s3183_s26 }
  0x7c   : > { %s3185_s13 = scalar_lea.vmem %s3184_s26, 8192  ;;  %p3186_p11 = scmp.lt.s32.totalorder %s3533_s12, %s3184_s26 }
  0x7d   : > { %p3181_p13 = pnand %p3179_p5, %p3422_p12  ;;  %p3187_p2 = scmp.lt.s32.totalorder %s3185_s13, %s3178_s24 }
  0x7f   : > { %p3182_p1 = pneg %p3181_p13  ;;  %p3188_p10 = por %p3187_p2, %p3186_p11 }
  0x81   : > { %p3189_p3 = pnand %p3188_p10, %p3182_p1 }
  0x83   : > { %3192 = shalt.err (!%p3189_p3)
}
  0x84   : > { %s3974_s23 = smov 4   ;;  %s3975_s2 = smov 64  }
  0x85   : > { %2792 = dma.hbm_to_vmem [thread:$0]  (!%p3401_p9), %s3529_s21, 4096, %s3533_s12, %s363_s20, %s3975_s2, %s3975_s2, %s3974_s23  }
  0x86   : > { %p3976_p12 = scmp.ne.s32.totalorder %s3972_s25, 0 }
  0x87   : > { %s402_s14 = sand.u32 (!%p3976_p12), 1, %s3265_s28   ;;  %p3977_p7 = scmp.ne.s32.totalorder (!%p3976_p12), %s3966_s15, 0 }
  0x88   : > { %400 = sbr.rel (%p3976_p12) target bundleno = 3494 (0xda6), region = 52  ;;  %s403_s29 = scalar_lea.sflag (!%p3976_p12), [#allocation4], %s402_s14 }
  0x89   : > { %s2767_s27 = smul.u32 (!%p3976_p12), 192, %s402_s14 }
  0x8b   : > { %s3565_s22 = scalar_lea.vmem (!%p3976_p12), [#allocation3], %s2767_s27 }
  0x8f   : > { %3244 = dma.done.wait (%p3977_p7), %s403_s29, 3072  }
  0x90   : > { %3246 = vsyncadd (%p3977_p7), %s403_s29, 4294964224  ;;  %s411_s17 = sand.u32 1, %s3377_s11   ;;  %s2470_s18 = sshll.u32 %s402_s14, 6 }
  0x91   : > { %s412_s21 = scalar_lea.sflag [#allocation7], %s411_s17  ;;  %s3572_s12 = scalar_lea.vmem [#allocation6], %s2470_s18 }
  0x92   : > { %3248 = dma.done.wait (%p3977_p7), %s412_s21, 5120  }
  0x93   : > { %3250 = vsyncadd (%p3977_p7), %s412_s21, 4294962176  ;;  %s2471_s25 = sshll.u32 %s402_s14, 8  ;;  %s430_s19 = scalar_lea.sflag [#allocation10], %s402_s14 }
  0x94   : > { %s3578_s20 = scalar_lea.vmem [#allocation8], %s2471_s25  ;;  %s3580_s1 = scalar_lea.vmem [#allocation9], %s2471_s25 }
  0x95   : > { %3252 = dma.done.wait (%p3977_p7), %s430_s19, 4096  }
  0x96   : > { %3254 = vsyncadd (%p3977_p7), %s430_s19, 4294963200  ;;  %p496_p9 = scmp.lt.s32.totalorder %s3273_s30, 1  ;;  %p2476_p4 = scmp.ne.s32.totalorder %s3273_s30, 0 }
  0x97   : > { %v511_v0 = vld [vmem:[%s3948_s0] sm:$0xff] (!%p2476_p4)  ;;  %v512_v1 = vld [vmem:[%s3948_s0 + $0x8] sm:$0xff] (!%p2476_p4) }
  0x98   : > { %s497_s24 = scalar_select %p496_p9, %s3273_s30, 1 }
  0x99   : > { %510 = sbr.rel (%p2476_p4) target bundleno = 160 (0xa0), region = 72  ;;  %513 = vst [vmem:[#allocation2] sm:$0xff] (!%p2476_p4), %v511_v0  ;;  %514 = vst [vmem:[#allocation2 + $0x8] sm:$0xff] (!%p2476_p4), %v512_v1 }
  0x9a   : > { %s2598_s16 = sshll.u32 %s497_s24, 4  ;;  %s2475_s26 = sshll.u32 %s497_s24, 2 }
  0x9b   : > { %s3591_s2 = scalar_lea.vmem %s3953_s5, %s2598_s16  ;;  %s3596_s29 = scalar_lea.vmem %s3954_s6, %s2475_s26 }
  0xa0 PF: > { %v515_v2 = vld [vmem:[#allocation2] sm:$0xff]  ;;  %v516_v3 = vld [vmem:[#allocation2 + $0x8] sm:$0xff]  ;;  %v2877_v5 = vld [vmem:[%s3565_s22] ss:$12 sps:$4 sm:$0xff]   ;;  %v3293_v6 = vmov 0.0   ;;  %v3294_v32 = vmov 0   ;;  %v519_v42 = vlaneseq }
  0xa1   : > { %554 = vadd.xlane.f32.xlu0 %v515_v2  ;;  %v2875_v4 = vld [vmem:[%s3565_s22 + $0x4] ss:$12 sps:$4 sm:$0xff]   ;;  %2677 = vmatprep.subr.bf16.mxu1 %v3293_v6  ;;  %v2878_v7 = vld [vmem:[%s3565_s22 + $0x8] ss:$12 sps:$4 sm:$0xff]   ;;  %v2882_v18 = vld [vmem:[%s3565_s22 + $0x20] ss:$12 sps:$4 sm:$0xff]  }
  0xa2   : > { %v2879_v8 = vld [vmem:[%s3565_s22 + $0x1c] ss:$12 sps:$4 sm:$0xff]   ;;  %750 = vmatprep.subr.bf16.mxu0 %v2875_v4  ;;  %2678 = vmatpush3.bf16.msra.mxu1 %v2878_v7  ;;  %v2881_v17 = vld [vmem:[%s3565_s22 + $0x18] ss:$12 sps:$4 sm:$0xff]   ;;  %v2883_v19 = vld [vmem:[%s3565_s22 + $0x34] ss:$12 sps:$4 sm:$0xff]  }
  0xa3   : > { %751 = vmatpush1.bf16.msra.mxu0 %v2877_v5  ;;  %2679 = vmatprep.subr.bf16.mxu1 %v3293_v6  ;;  %v2885_v20 = vld [vmem:[%s3565_s22 + $0x30] ss:$12 sps:$4 sm:$0xff]   ;;  %v2886_v21 = vld [vmem:[%s3565_s22 + $0x38] ss:$12 sps:$4 sm:$0xff]   ;;  %v2889_v23 = vld [vmem:[%s3565_s22 + $0x48] ss:$12 sps:$4 sm:$0xff]  }
  0xa4   : > { %752 = vmatprep.subr.bf16.mxu0 %v2879_v8  ;;  %v2887_v22 = vld [vmem:[%s3565_s22 + $0x4c] ss:$12 sps:$4 sm:$0xff]   ;;  %v2890_v24 = vld [vmem:[%s3565_s22 + $0x50] ss:$12 sps:$4 sm:$0xff]   ;;  %v2894_v27 = vld [vmem:[%s3565_s22 + $0x68] ss:$12 sps:$4 sm:$0xff]   ;;  %782 = vmatprep.mubr.bf16.mxu0 %v3294_v32 }
  0xa5   : > { %556 = vadd.xlane.f32.xlu0 %v516_v3  ;;  %v2891_v25 = vld [vmem:[%s3565_s22 + $0x64] ss:$12 sps:$4 sm:$0xff]   ;;  %v2893_v26 = vld [vmem:[%s3565_s22 + $0x60] ss:$12 sps:$4 sm:$0xff]   ;;  %v2895_v28 = vld [vmem:[%s3565_s22 + $0x7c] ss:$12 sps:$4 sm:$0xff]  }
  0xa6   : > { %2680 = vmatpush3.bf16.msra.mxu1 %v2882_v18  ;;  %v2897_v29 = vld [vmem:[%s3565_s22 + $0x78] ss:$12 sps:$4 sm:$0xff]   ;;  %v2898_v30 = vld [vmem:[%s3565_s22 + $0x80] ss:$12 sps:$4 sm:$0xff]   ;;  %vm3295_vm0 = vmmov 0   ;;  %v3650_v45 = vshrl.u32 %v519_v42, 7 }
  0xa7   : > { %753 = vmatpush1.bf16.msra.mxu0 %v2881_v17  ;;  %2681 = vmatprep.subr.bf16.mxu1 %v3293_v6  ;;  %v2899_v31 = vld [vmem:[%s3565_s22 + $0x94] ss:$12 sps:$4 sm:$0xff]   ;;  %v2901_v33 = vld [vmem:[%s3565_s22 + $0x90] ss:$12 sps:$4 sm:$0xff]   ;;  %v2902_v34 = vld [vmem:[%s3565_s22 + $0x98] ss:$12 sps:$4 sm:$0xff]  }
  0xa8   : > { %754 = vmatprep.subr.bf16.mxu0 %v2883_v19  ;;  %2693 = vmatprep.mubr.msk.bf16.mxu1 %vm3295_vm0, %v3293_v6  ;;  %v2903_v35 = vld [vmem:[%s3565_s22 + $0xac] ss:$12 sps:$4 sm:$0xff]   ;;  %v2905_v36 = vld [vmem:[%s3565_s22 + $0xa8] ss:$12 sps:$4 sm:$0xff]   ;;  %v2906_v37 = vld [vmem:[%s3565_s22 + $0xb0] ss:$12 sps:$4 sm:$0xff]  }
  0xa9   : > { %v3653_v46 = vsub.s32 0, %v3650_v45  ;;  %v3656_v47 = vld [vmem:[%s3591_s2] sm:$0xff]  ;;  %v3662_v51 = vsub.s32 1, %v3650_v45  ;;  %v836_v60 = vsub.s32 2, %v3650_v45  ;;  %v852_v61 = vsub.s32 4, %v3650_v45  ;;  %s3297_s22 = smov 96  }
  0xaa   : > { %2682 = vmatpush3.bf16.msra.mxu1 %v2886_v21  ;;  %v845_v62 = vsub.s32 3, %v3650_v45  ;;  %vm857_vm1 = vcmask 261120   ;;  %vm905_vm10 = vcmask 130048   ;;  %s3298_s25 = smov 64   ;;  %s3299_s19 = smov 32   ;;  %vm1365_vm11 = vcmask 523264  }
  0xab   : > { %755 = vmatpush1.bf16.msra.mxu0 %v2885_v20  ;;  %2683 = vmatprep.subr.bf16.mxu1 %v3293_v6  ;;  %v580_v50 = vrot.slane %v3656_v47, %v3653_v46  ;;  %v586_v55 = vrot.slane %v3656_v47, %v3662_v51  ;;  %v837_v63 = vrot.slane %v3656_v47, %v836_v60  ;;  %vm1368_vm12 = vcmask 785408   ;;  %p2590_p6 = scmp.ne.s32.totalorder %s3273_s30, 1 }
  0xac   : > { %756 = vmatprep.subr.bf16.mxu0 %v2887_v22  ;;  %v853_v0 = vrot.slane %v3656_v47, %v852_v61 }
  0xae   : > { %2684 = vmatpush3.bf16.msra.mxu1 %v2890_v24  ;;  %v521_v24 = vadd.s32 8, %v3650_v45 }
  0xaf   : > { %757 = vmatpush1.bf16.msra.mxu0 %v2889_v23  ;;  %2685 = vmatprep.subr.bf16.mxu1 %v3293_v6  ;;  %v523_v23 = vand.u32 127, %v519_v42 }
  0xb0   : > { %758 = vmatprep.subr.bf16.mxu0 %v2891_v25  ;;  %v3296_v25 = vmov -1e+09  }
  0xb1   : > { %vm543_vm2 = vcmp.ge.s32.totalorder %v523_v23, 8  ;;  %vm544_vm3 = vcmp.lt.s32.totalorder %v523_v23, 16  ;;  %vm524_vm4 = vcmp.le.s32.totalorder %v523_v23, %v3650_v45  ;;  %vm533_vm5 = vcmp.lt.s32.totalorder %v523_v23, 8 }
  0xb2   : > { %2686 = vmatpush3.bf16.msra.mxu1 %v2894_v27  ;;  %vm525_vm6 = vcmp.le.s32.totalorder %v523_v23, %v521_v24  ;;  %vm545_vm7 = vmand %vm543_vm2, %vm544_vm3 }
  0xb3   : > { %759 = vmatpush1.bf16.msra.mxu0 %v2893_v26  ;;  %2687 = vmatprep.subr.bf16.mxu1 %v3293_v6  ;;  %vm550_vm8 = vmand %vm524_vm4, %vm533_vm5 }
  0xb4   : > { %760 = vmatprep.subr.bf16.mxu0 %v2895_v28  ;;  %vm551_vm9 = vmand %vm525_vm6, %vm545_vm7  ;;  %v3692_v26 = vsel %vm550_vm8, 0.0, %v3296_v25 }
  0xb5   : > { %v3694_v28 = vsel %vm551_vm9, 0.0, %v3296_v25 }
  0xb6   : > { %2688 = vmatpush3.bf16.msra.mxu1 %v2898_v30 }
  0xb7   : > { %761 = vmatpush1.bf16.msra.mxu0 %v2897_v29  ;;  %2689 = vmatprep.subr.bf16.mxu1 %v3293_v6 }
  0xb8   : > { %762 = vmatprep.subr.bf16.mxu0 %v2899_v31 }
  0xba   : > { %2690 = vmatpush3.bf16.msra.mxu1 %v2902_v34 }
  0xbb   : > { %763 = vmatpush1.bf16.msra.mxu0 %v2901_v33  ;;  %2691 = vmatprep.subr.bf16.mxu1 %v3293_v6 }
  0xbc   : > { %764 = vmatprep.subr.bf16.mxu0 %v2903_v35 }
  0xbe   : > { %2692 = vmatpush3.bf16.msra.mxu1 %v2906_v37 }
  0xbf   : > { %765 = vmatpush1.bf16.msra.mxu0 %v2905_v36  ;;  %2697 = vmatprep.subr.bf16.mxu1 %v3293_v6 }
  0xc0   : > { %2721 = vmatprep.subr.bf16.mxu0 %v3293_v6 }
 0x12e   : > { %v555_v9 = vpop.xlane.xlu0 %554 }
 0x12f   : > { %v559_v10 = vmul.f32 0.0078125, %v555_v9 }
 0x131   : > { %v3611_v11 = vsub.f32 %v515_v2, %v559_v10 }
 0x132   : > { %v557_v12 = vpop.xlane.xlu0 %556 }
 0x133   : > { %v560_v13 = vmul.f32 0.0078125, %v557_v12  ;;  %v563_v14 = vmul.f32 %v3611_v11, %v3611_v11 }
 0x135   : > { %v3615_v15 = vsub.f32 %v516_v3, %v560_v13  ;;  %565 = vadd.xlane.f32.xlu1 %v563_v14  ;;  %v846_v3 = vrot.slane %v3656_v47, %v845_v62 }
 0x137   : > { %v564_v16 = vmul.f32 %v3615_v15, %v3615_v15 }
 0x139   : > { %567 = vadd.xlane.f32.xlu1 %v564_v16 }
 0x1c2   : > { %v566_v38 = vpop.xlane.xlu1 %565 }
 0x1c3   : > { %v569_v39 = vmul.f32 0.0078125, %v566_v38 }
 0x1c5   : > { %v571_v40 = vadd.f32 1e-05, %v569_v39 }
 0x1c6   : > { %v568_v41 = vpop.xlane.xlu1 %567 }
 0x1c7   : > { %2995 = vrsqrt.f32 %v571_v40  ;;  %v570_v43 = vmul.f32 0.0078125, %v568_v41 }
 0x1c9   : > { %v572_v44 = vadd.f32 1e-05, %v570_v43 }
 0x1cb   : > { %2997 = vrsqrt.f32 %v572_v44 }
 0x1d1   : > { %v2996_v48 = vpop.eup %2995 }
 0x1d2   : > { %v575_v49 = vmul.f32 %v2996_v48, %v3611_v11 }
 0x1d4   : > { %v581_v54 = vmul.f32 %v580_v50, %v575_v49 }
 0x1d5   : > { %v2998_v52 = vpop.eup %2997 }
 0x1d6   : > { %v576_v53 = vmul.f32 %v2998_v52, %v3615_v15  ;;  %v587_v57 = vadd.f32 %v586_v55, %v581_v54 }
 0x1d8   : > { %v582_v56 = vmul.f32 %v580_v50, %v576_v53 }
 0x1da   : > { %v588_v58 = vadd.f32 %v586_v55, %v582_v56 }
 0x1dc   : > { %v589_v59 = vpack.c.bf16 %v588_v58, %v587_v57 }
 0x1de   : > { %783 = vmatmul.mubr.bf16.vlgmr.msra.gmra.mrb[0].mxu0 %v589_v59  ;;  %2694 = vmatmul.mubr.bf16.vlgmr.msra.gmra.mrb[0].mxu1 %v589_v59 }
 0x1df   : > { %2699 = vmatprep.mubr.msk.bf16.mxu1 %vm3295_vm0, %v3293_v6  ;;  %2723 = vmatprep.mubr.msk.bf16.mxu0 %vm3295_vm0, %v3293_v6 }
 0x2b1   : > { %v784_v1 = vpop.f32.mrb[0].mxu0  ;;  %v827_v2 = vpop.f32.mrb[0].mxu1 }
 0x2b2   : > { %v838_v4 = vadd.f32 %v837_v63, %v784_v1  ;;  %v786_v5 = vpop.f32.mrb[1].mxu0  ;;  %v2695_v7 = vpop.f32.mrb[1].mxu1  ;;  %v854_v10 = vadd.f32 %v853_v0, %v827_v2 }
 0x2b3   : > { %v788_v8 = vpop.f32.mrb[2].mxu0  ;;  %v830_v9 = vpop.f32.mrb[2].mxu1  ;;  %v847_v15 = vadd.f32 %v846_v3, %v786_v5 }
 0x2b4   : > { %v839_v11 = vadd.f32 %v837_v63, %v788_v8  ;;  %v855_v12 = vadd.f32 %v853_v0, %v830_v9  ;;  %v790_v13 = vpop.f32.mrb[3].mxu0  ;;  %v2696_v14 = vpop.f32.mrb[3].mxu1  ;;  %v840_v17 = vmul.f32 0.17677669, %v838_v4 }
 0x2b5   : > { %v848_v16 = vadd.f32 %v846_v3, %v790_v13 }
 0x2b6   : > { %v841_v18 = vmul.f32 0.17677669, %v839_v11  ;;  %v3681_v19 = vpack.c.bf16 %v855_v12, %v854_v10 }
 0x2b7   : > { %v849_v20 = vpack.c.bf16 %v848_v16, %v847_v15 }
 0x2b8   : > { %v842_v21 = vpack.c.bf16 %v841_v18, %v840_v17 }
 0x2b9   : > { %v862_v22 = vsel %vm857_vm1, %v849_v20, 0 }
 0x2ba   : > { %2698 = vmatpush3.bf16.xpose.msra.mxu1 %v862_v22 }
 0x2bb   : > { %2703 = vmatprep.subr.bf16.mxu1 %v3293_v6 }
 0x2c1   : > { %2700 = vmatmul.mubr.msk.bf16.vlgmr.msra.gmra.mrb[4].mxu1 %vm857_vm1, %v842_v21 }
 0x2c2   : > { %2704 = vmatpush3.bf16.msra.mxu1 %v3681_v19  ;;  %2705 = vmatprep.mubr.msk.bf16.mxu1 %vm3295_vm0, %v3293_v6 }
 0x2c3   : > { %2709 = vmatprep.subr.bf16.mxu1 %v3293_v6 }
 0x394   : > { %v898_v27 = vpop.f32.mrb[4].mxu1 }
 0x395   : > { %v899_v29 = vadd.f32 %v898_v27, %v3692_v26  ;;  %v2701_v30 = vpop.f32.mrb[5].mxu1 }
 0x396   : > { %v901_v31 = vpop.f32.mrb[6].mxu1 }
 0x397   : > { %v902_v33 = vadd.f32 %v901_v31, %v3694_v28  ;;  %v2702_v34 = vpop.f32.mrb[7].mxu1  ;;  %v906_v35 = vsel %vm905_vm10, %v899_v29, -inf }
 0x398   : > { %907 = vmax.xlane.f32.xlu0 %v906_v35 }
 0x399   : > { %v909_v36 = vsel %vm905_vm10, %v902_v33, -inf }
 0x39a   : > { %910 = vmax.xlane.f32.xlu1 %v909_v36 }
 0x425   : > { %v908_v37 = vpop.xlane.xlu0 %907 }
 0x426   : > { %v912_v38 = vsub.f32 %v899_v29, %v908_v37 }
 0x427   : > { %v911_v39 = vpop.xlane.xlu1 %910 }
 0x428   : > { %v914_v40 = vmul.f32 1.442695, %v912_v38  ;;  %v913_v41 = vsub.f32 %v902_v33, %v911_v39 }
 0x42a   : > { %2999 = vpow2.f32 %v914_v40  ;;  %v916_v42 = vmul.f32 1.442695, %v913_v41 }
 0x42c   : > { %3001 = vpow2.f32 %v916_v42 }
 0x434   : > { %v3000_v43 = vpop.eup %2999 }
 0x435   : > { %v918_v44 = vsel %vm905_vm10, %v3000_v43, 0.0 }
 0x436   : > { %v3002_v48 = vpop.eup %3001  ;;  %919 = vadd.xlane.f32.xlu0 %v918_v44 }
 0x437   : > { %v921_v49 = vsel %vm905_vm10, %v3002_v48, 0.0 }
 0x438   : > { %922 = vadd.xlane.f32.xlu1 %v921_v49 }
 0x449   : > { %974 = vrot.lane.b32.xlu1 %v842_v21, %s3297_s22 }
 0x44c   : > { %977 = vrot.lane.b32.xlu0 %v849_v20, %s3297_s22 }
 0x44d   : > { %1099 = vrot.lane.b32.xlu1 %v849_v20, %s3298_s25 }
 0x450   : > { %1220 = vrot.lane.b32.xlu0 %v849_v20, %s3299_s19 }
 0x451   : > { %1097 = vrot.lane.b32.xlu1 %v842_v21, %s3298_s25 }
 0x455   : > { %1218 = vrot.lane.b32.xlu1 %v842_v21, %s3299_s19 }
 0x4c3   : > { %v920_v50 = vpop.xlane.xlu0 %919 }
 0x4c4   : > { %3003 = vrcp.f32 %v920_v50 }
 0x4c5   : > { %v923_v52 = vpop.xlane.xlu1 %922 }
 0x4c6   : > { %3005 = vrcp.f32 %v923_v52 }
 0x4c7   : > { %v978_v54 = vpop.permute.xlu0 %977 }
 0x4c8   : > { %v983_v1 = vsel %vm857_vm1, %v978_v54, 0 }
 0x4c9   : > { %v975_v53 = vpop.permute.xlu1 %974 }
 0x4cb   : > { %v1221_v63 = vpop.permute.xlu0 %1220 }
 0x4cc   : > { %v1226_v3 = vsel %vm857_vm1, %v1221_v63, 0 }
 0x4cd   : > { %v1100_v55 = vpop.permute.xlu1 %1099 }
 0x4ce   : > { %v3004_v56 = vpop.eup %3003  ;;  %v1105_v57 = vsel %vm857_vm1, %v1100_v55, 0 }
 0x4cf   : > { %2722 = vmatpush3.bf16.xpose.msra.mxu0 %v1105_v57  ;;  %v926_v59 = vmul.f32 %v3004_v56, %v3000_v43 }
 0x4d0   : > { %v3006_v58 = vpop.eup %3005  ;;  %2733 = vmatprep.subr.bf16.mxu0 %v3293_v6 }
 0x4d1   : > { %v927_v61 = vmul.f32 %v3006_v58, %v3002_v48  ;;  %v1098_v2 = vpop.permute.xlu1 %1097 }
 0x4d3   : > { %v928_v0 = vpack.c.bf16 %v927_v61, %v926_v59 }
 0x4d5   : > { %2706 = vmatmul.mubr.msk.bf16.vlgmr.msra.gmra.mrb[8].mxu1 %vm905_vm10, %v928_v0  ;;  %v1219_v4 = vpop.permute.xlu1 %1218 }
 0x4d6   : > { %2710 = vmatpush3.bf16.xpose.msra.mxu1 %v983_v1  ;;  %2724 = vmatmul.mubr.msk.bf16.vlgmr.msra.gmra.mrb[4].mxu0 %vm857_vm1, %v1098_v2 }
 0x4d7   : > { %2734 = vmatpush3.bf16.xpose.msra.mxu0 %v1226_v3  ;;  %2711 = vmatprep.mubr.msk.bf16.mxu1 %vm3295_vm0, %v3293_v6 }
 0x4d8   : > { %2735 = vmatprep.mubr.msk.bf16.mxu0 %vm3295_vm0, %v3293_v6  ;;  %2715 = vmatprep.subr.bf16.mxu1 %v3293_v6 }
 0x4d9   : > { %2745 = vmatprep.subr.bf16.mxu0 %v3293_v6 }
 0x4dd   : > { %2712 = vmatmul.mubr.msk.bf16.vlgmr.msra.gmra.mrb[12].mxu1 %vm857_vm1, %v975_v53 }
 0x4de   : > { %2736 = vmatmul.mubr.msk.bf16.vlgmr.msra.gmra.mrb[8].mxu0 %vm857_vm1, %v1219_v4  ;;  %2717 = vmatprep.mubr.msk.bf16.mxu1 %vm3295_vm0, %v3293_v6 }
 0x4df   : > { %2761 = vmatprep.mubr.msk.bf16.mxu0 %vm3295_vm0, %v3293_v6 }
 0x5a8   : > { %v3726_v5 = vpop.f32.mrb[8].mxu1 }
 0x5a9   : > { %v2707_v7 = vpop.f32.mrb[9].mxu1  ;;  %v1141_v8 = vpop.f32.mrb[4].mxu0 }
 0x5aa   : > { %v3728_v9 = vpop.f32.mrb[10].mxu1  ;;  %v2725_v10 = vpop.f32.mrb[5].mxu0  ;;  %v1142_v21 = vadd.f32 %v1141_v8, %v3692_v26 }
 0x5ab   : > { %v2708_v11 = vpop.f32.mrb[11].mxu1  ;;  %v1144_v12 = vpop.f32.mrb[6].mxu0 }
 0x5ac   : > { %v2726_v13 = vpop.f32.mrb[7].mxu0  ;;  %v1145_v31 = vadd.f32 %v1144_v12, %v3694_v28  ;;  %v1148_v33 = vsel %vm905_vm10, %v1142_v21, -inf }
 0x5ae   : > { %v1151_v36 = vsel %vm905_vm10, %v1145_v31, -inf }
 0x5b0   : > { %v1019_v14 = vpop.f32.mrb[12].mxu1 }
 0x5b1   : > { %v1020_v15 = vadd.f32 %v1019_v14, %v3692_v26  ;;  %v2713_v16 = vpop.f32.mrb[13].mxu1  ;;  %v1262_v17 = vpop.f32.mrb[8].mxu0 }
 0x5b2   : > { %v1022_v18 = vpop.f32.mrb[14].mxu1  ;;  %v2737_v20 = vpop.f32.mrb[9].mxu0  ;;  %v1263_v35 = vadd.f32 %v1262_v17, %v3692_v26 }
 0x5b3   : > { %v1023_v22 = vadd.f32 %v1022_v18, %v3694_v28  ;;  %v2714_v23 = vpop.f32.mrb[15].mxu1  ;;  %v1265_v24 = vpop.f32.mrb[10].mxu0  ;;  %v1026_v25 = vsel %vm905_vm10, %v1020_v15, -inf }
 0x5b4   : > { %v2738_v27 = vpop.f32.mrb[11].mxu0  ;;  %1027 = vmax.xlane.f32.xlu0 %v1026_v25  ;;  %v1266_v29 = vadd.f32 %v1265_v24, %v3694_v28  ;;  %v1269_v37 = vsel %vm905_vm10, %v1263_v35, -inf }
 0x5b5   : > { %v1029_v30 = vsel %vm905_vm10, %v1023_v22, -inf }
 0x5b6   : > { %1030 = vmax.xlane.f32.xlu1 %v1029_v30  ;;  %v1272_v34 = vsel %vm905_vm10, %v1266_v29, -inf }
 0x5b8   : > { %1149 = vmax.xlane.f32.xlu0 %v1148_v33 }
 0x5ba   : > { %1273 = vmax.xlane.f32.xlu1 %v1272_v34 }
 0x5bc   : > { %1152 = vmax.xlane.f32.xlu0 %v1151_v36 }
 0x5c0   : > { %1270 = vmax.xlane.f32.xlu0 %v1269_v37 }
 0x641   : > { %v1028_v38 = vpop.xlane.xlu0 %1027 }
 0x642   : > { %v1032_v49 = vsub.f32 %v1020_v15, %v1028_v38  ;;  %v2907_v38 = vld [vmem:[%s3572_s12] sm:$0xff]  }
 0x643   : > { %v1031_v39 = vpop.xlane.xlu1 %1030  ;;  %2746 = vmatpush3.bf16.msra.mxu0 %v2907_v38  ;;  %v2924_v38 = vld [vmem:[%s3578_s20 + $0x28] ss:$16 sps:$4 sm:$0xff]  }
 0x644   : > { %v1033_v50 = vsub.f32 %v1023_v22, %v1031_v39  ;;  %v1034_v55 = vmul.f32 1.442695, %v1032_v49  ;;  %v2908_v39 = vld [vmem:[%s3572_s12 + $0x8] sm:$0xff]   ;;  %2747 = vmatprep.subr.bf16.mxu0 %v3293_v6 }
 0x645   : > { %v1150_v40 = vpop.xlane.xlu0 %1149 }
 0x646   : > { %v1154_v41 = vsub.f32 %v1142_v21, %v1150_v40  ;;  %v1036_v56 = vmul.f32 1.442695, %v1033_v50  ;;  %v2909_v40 = vld [vmem:[%s3572_s12 + $0x10] sm:$0xff]  }
 0x647   : > { %v1274_v42 = vpop.xlane.xlu1 %1273  ;;  %2748 = vmatpush3.bf16.msra.mxu0 %v2908_v39 }
 0x648   : > { %v1156_v28 = vmul.f32 1.442695, %v1154_v41  ;;  %v1276_v43 = vsub.f32 %v1266_v29, %v1274_v42  ;;  %2749 = vmatprep.subr.bf16.mxu0 %v3293_v6  ;;  %v2910_v41 = vld [vmem:[%s3572_s12 + $0x18] sm:$0xff]   ;;  %v2911_v42 = vld [vmem:[%s3572_s12 + $0x20] sm:$0xff]  }
 0x649   : > { %v1153_v44 = vpop.xlane.xlu0 %1152 }
 0x64a   : > { %3007 = vpow2.f32 %v1156_v28  ;;  %v1155_v48 = vsub.f32 %v1145_v31, %v1153_v44  ;;  %v1279_v52 = vmul.f32 1.442695, %v1276_v43  ;;  %v2912_v44 = vld [vmem:[%s3572_s12 + $0x28] sm:$0xff]  }
 0x64b   : > { %2750 = vmatpush3.bf16.msra.mxu0 %v2909_v40 }
 0x64c   : > { %v1158_v26 = vmul.f32 1.442695, %v1155_v48  ;;  %2751 = vmatprep.subr.bf16.mxu0 %v3293_v6 }
 0x64d   : > { %v1271_v53 = vpop.xlane.xlu0 %1270 }
 0x64e   : > { %3009 = vpow2.f32 %v1158_v26  ;;  %v1275_v54 = vsub.f32 %v1263_v35, %v1271_v53 }
 0x64f   : > { %3011 = vpow2.f32 %v1279_v52  ;;  %2752 = vmatpush3.bf16.msra.mxu0 %v2910_v41  ;;  %v2913_v52 = vld [vmem:[%s3572_s12 + $0x30] sm:$0xff]  }
 0x650   : > { %v1277_v57 = vmul.f32 1.442695, %v1275_v54  ;;  %2753 = vmatprep.subr.bf16.mxu0 %v3293_v6  ;;  %v2914_v54 = vld [vmem:[%s3572_s12 + $0x38] sm:$0xff]  }
 0x652   : > { %3013 = vpow2.f32 %v1277_v57 }
 0x653   : > { %3015 = vpow2.f32 %v1034_v55  ;;  %2754 = vmatpush3.bf16.msra.mxu0 %v2911_v42 }
 0x654   : > { %v3008_v58 = vpop.eup %3007  ;;  %3017 = vpow2.f32 %v1036_v56  ;;  %2755 = vmatprep.subr.bf16.mxu0 %v3293_v6 }
 0x655   : > { %v1160_v59 = vsel %vm905_vm10, %v3008_v58, 0.0 }
 0x656   : > { %1161 = vadd.xlane.f32.xlu0 %v1160_v59 }
 0x657   : > { %2756 = vmatpush3.bf16.msra.mxu0 %v2912_v44 }
 0x658   : > { %v3010_v61 = vpop.eup %3009  ;;  %2757 = vmatprep.subr.bf16.mxu0 %v3293_v6 }
 0x659   : > { %v1163_v63 = vsel %vm905_vm10, %v3010_v61, 0.0  ;;  %v3012_v0 = vpop.eup %3011 }
 0x65a   : > { %1164 = vadd.xlane.f32.xlu1 %v1163_v63  ;;  %v1284_v4 = vsel %vm905_vm10, %v3012_v0, 0.0 }
 0x65b   : > { %2758 = vmatpush3.bf16.msra.mxu0 %v2913_v52  ;;  %v2927_v52 = vld [vmem:[%s3578_s20 + $0x40] ss:$16 sps:$4 sm:$0xff]  }
 0x65c   : > { %v3014_v1 = vpop.eup %3013  ;;  %2759 = vmatprep.subr.bf16.mxu0 %v3293_v6 }
 0x65d   : > { %v3016_v2 = vpop.eup %3015  ;;  %v1281_v3 = vsel %vm905_vm10, %v3014_v1, 0.0 }
 0x65e   : > { %v3018_v7 = vpop.eup %3017  ;;  %1282 = vadd.xlane.f32.xlu0 %v1281_v3  ;;  %1285 = vadd.xlane.f32.xlu1 %v1284_v4  ;;  %v1038_v8 = vsel %vm905_vm10, %v3016_v2, 0.0 }
 0x65f   : > { %v1041_v10 = vsel %vm905_vm10, %v3018_v7, 0.0  ;;  %2760 = vmatpush3.bf16.msra.mxu0 %v2914_v54  ;;  %v2938_v54 = vld [vmem:[%s3578_s20 + $0x6c] ss:$16 sps:$4 sm:$0xff]  }
 0x662   : > { %1039 = vadd.xlane.f32.xlu0 %v1038_v8  ;;  %1042 = vadd.xlane.f32.xlu1 %v1041_v10 }
 0x673   : > { %1171 = vrot.lane.b32.xlu1 %v3681_v19, %s3298_s25 }
 0x677   : > { %1292 = vrot.lane.b32.xlu1 %v3681_v19, %s3299_s19 }
 0x678   : > { %1050 = vrot.lane.b32.xlu0 %v3681_v19, %s3297_s22 }
 0x6e3   : > { %v1162_v11 = vpop.xlane.xlu0 %1161 }
 0x6e7   : > { %v1165_v12 = vpop.xlane.xlu1 %1164 }
 0x6eb   : > { %v1283_v13 = vpop.xlane.xlu0 %1282  ;;  %v1286_v14 = vpop.xlane.xlu1 %1285 }
 0x6ef   : > { %v1040_v15 = vpop.xlane.xlu0 %1039  ;;  %v1043_v16 = vpop.xlane.xlu1 %1042 }
 0x6f0   : > { %3019 = vrcp.f32 %v1040_v15 }
 0x6f1   : > { %3021 = vrcp.f32 %v1043_v16 }
 0x6f2   : > { %3023 = vrcp.f32 %v1165_v12 }
 0x6f3   : > { %v1051_v17 = vpop.permute.xlu0 %1050  ;;  %3025 = vrcp.f32 %v1162_v11  ;;  %v1172_v24 = vpop.permute.xlu1 %1171 }
 0x6f4   : > { %2716 = vmatpush3.bf16.msra.mxu1 %v1051_v17  ;;  %3027 = vrcp.f32 %v1283_v13 }
 0x6f5   : > { %2727 = vmatprep.subr.bf16.mxu1 %v3293_v6  ;;  %3029 = vrcp.f32 %v1286_v14 }
 0x6f7   : > { %v1293_v34 = vpop.permute.xlu1 %1292 }
 0x6fa   : > { %v3020_v18 = vpop.eup %3019 }
 0x6fb   : > { %v3022_v20 = vpop.eup %3021  ;;  %v1046_v21 = vmul.f32 %v3020_v18, %v3016_v2 }
 0x6fc   : > { %v1047_v22 = vmul.f32 %v3022_v20, %v3018_v7  ;;  %v3024_v23 = vpop.eup %3023  ;;  %v1481_v20 = vsub.s32 5, %v3650_v45 }
 0x6fd   : > { %v3026_v25 = vpop.eup %3025  ;;  %v1169_v27 = vmul.f32 %v3024_v23, %v3010_v61 }
 0x6fe   : > { %v1048_v19 = vpack.c.bf16 %v1047_v22, %v1046_v21  ;;  %v1168_v29 = vmul.f32 %v3026_v25, %v3008_v58  ;;  %v3028_v30 = vpop.eup %3027  ;;  %v3068_v25 = vld [vmem:[#allocation2 + $0x8] sm:$0xff] }
 0x6ff   : > { %v3030_v33 = vpop.eup %3029  ;;  %v1289_v35 = vmul.f32 %v3028_v30, %v3014_v1  ;;  %v2915_v30 = vld [vmem:[%s3578_s20] ss:$16 sps:$4 sm:$0xff]  }
 0x700   : > { %2718 = vmatmul.mubr.msk.bf16.vlgmr.msra.gmra.mrb[16].mxu1 %vm905_vm10, %v1048_v19  ;;  %v1170_v31 = vpack.c.bf16 %v1169_v27, %v1168_v29  ;;  %v1290_v36 = vmul.f32 %v3030_v33, %v3012_v0  ;;  %v2918_v33 = vld [vmem:[%s3578_s20 + $0x8] ss:$16 sps:$4 sm:$0xff]  }
 0x701   : > { %2728 = vmatpush3.bf16.msra.mxu1 %v1172_v24  ;;  %2729 = vmatprep.mubr.msk.bf16.mxu1 %vm3295_vm0, %v3293_v6 }
 0x702   : > { %2739 = vmatprep.subr.bf16.mxu1 %v3293_v6  ;;  %v1291_v37 = vpack.c.bf16 %v1290_v36, %v1289_v35  ;;  %v2923_v35 = vld [vmem:[%s3578_s20 + $0x24] ss:$16 sps:$4 sm:$0xff]   ;;  %v2926_v36 = vld [vmem:[%s3578_s20 + $0x2c] ss:$16 sps:$4 sm:$0xff]  }
 0x708   : > { %2730 = vmatmul.mubr.msk.bf16.vlgmr.msra.gmra.mrb[20].mxu1 %vm905_vm10, %v1170_v31  ;;  %v2917_v31 = vld [vmem:[%s3578_s20 + $0x4] ss:$16 sps:$4 sm:$0xff]  }
 0x709   : > { %2740 = vmatpush3.bf16.msra.mxu1 %v1293_v34  ;;  %2741 = vmatprep.mubr.msk.bf16.mxu1 %vm3295_vm0, %v3293_v6  ;;  %v2920_v34 = vld [vmem:[%s3578_s20 + $0xc] ss:$16 sps:$4 sm:$0xff]  }
 0x70a   : > { %1734 = vmatprep.subr.bf16.mxu1 %v2917_v31  ;;  %1777 = vmatprep.subr.bf16.mxu0 %v2920_v34  ;;  %v2963_v34 = vld [vmem:[%s3580_s1 + $0x40] sm:$0xff]  }
 0x710   : > { %2742 = vmatmul.mubr.msk.bf16.vlgmr.msra.gmra.mrb[24].mxu1 %vm905_vm10, %v1291_v37  ;;  %v2921_v37 = vld [vmem:[%s3578_s20 + $0x20] ss:$16 sps:$4 sm:$0xff]  }
 0x711   : > { %1766 = vmatprep.mubr.bf16.mxu1 %v3294_v32  ;;  %1735 = vmatpush1.bf16.msra.mxu1 %v2915_v30 }
 0x712   : > { %1736 = vmatprep.subr.bf16.mxu1 %v2923_v35  ;;  %v2964_v35 = vld [vmem:[%s3580_s1 + $0xc0] sm:$0xff]  }
 0x715   : > { %1737 = vmatpush1.bf16.msra.mxu1 %v2921_v37  ;;  %v2966_v37 = vld [vmem:[%s3580_s1 + $0x80] sm:$0xff]  }
 0x7d3   : > { %v1090_v28 = vpop.f32.mrb[16].mxu1 }
 0x7d4   : > { %v2719_v43 = vpop.f32.mrb[17].mxu1 }
 0x7d5   : > { %v1093_v48 = vpop.f32.mrb[18].mxu1 }
 0x7d6   : > { %v2860_v49 = vpack.i.bf16 %v1093_v48, %v1090_v28  ;;  %v2720_v50 = vpop.f32.mrb[19].mxu1 }
 0x7d7   : > { %v2932_v50 = vld [vmem:[%s3578_s20 + $0x4c] ss:$16 sps:$4 sm:$0xff]  }
 0x7d8   : > { %2861 = vrot.lane.b32.xlu1 %v2860_v49, %s3299_s19  ;;  %v2929_v49 = vld [vmem:[%s3578_s20 + $0x44] ss:$16 sps:$4 sm:$0xff]  }
 0x7d9   : > { %1738 = vmatprep.subr.bf16.mxu1 %v2929_v49  ;;  %v2977_v49 = vld [vmem:[%s3580_s1 + $0x18] sm:$0xff]  }
 0x7da   : > { %1739 = vmatpush1.bf16.msra.mxu1 %v2927_v52  ;;  %v2979_v52 = vld [vmem:[%s3580_s1 + $0x60] sm:$0xff]  }
 0x7db   : > { %v1211_v26 = vpop.f32.mrb[20].mxu1 }
 0x7dc   : > { %v2731_v53 = vpop.f32.mrb[21].mxu1 }
 0x7dd   : > { %v1214_v55 = vpop.f32.mrb[22].mxu1  ;;  %v2935_v53 = vld [vmem:[%s3578_s20 + $0x64] ss:$16 sps:$4 sm:$0xff]  }
 0x7de   : > { %v2865_v56 = vpack.i.bf16 %v1214_v55, %v1211_v26  ;;  %v2732_v57 = vpop.f32.mrb[23].mxu1  ;;  %v2930_v26 = vld [vmem:[%s3578_s20 + $0x48] ss:$16 sps:$4 sm:$0xff]   ;;  %v2933_v55 = vld [vmem:[%s3578_s20 + $0x60] ss:$16 sps:$4 sm:$0xff]   ;;  %1740 = vmatprep.subr.bf16.mxu1 %v2935_v53 }
 0x7df   : > { %1741 = vmatpush1.bf16.msra.mxu1 %v2933_v55  ;;  %v2941_v57 = vld [vmem:[%s3578_s20 + $0x84] ss:$16 sps:$4 sm:$0xff]   ;;  %v2983_v55 = vld [vmem:[%s3580_s1 + $0x68] sm:$0xff]  }
 0x7e0   : > { %2866 = vrot.lane.b32.xlu0 %v2865_v56, %s3298_s25  ;;  %v2936_v56 = vld [vmem:[%s3578_s20 + $0x68] ss:$16 sps:$4 sm:$0xff]   ;;  %1742 = vmatprep.subr.bf16.mxu1 %v2941_v57  ;;  %v2981_v53 = vld [vmem:[%s3580_s1 + $0x20] sm:$0xff]  }
 0x7e1   : > { %v2985_v57 = vld [vmem:[%s3580_s1 + $0x28] sm:$0xff]  }
 0x7e3   : > { %v1332_v58 = vpop.f32.mrb[24].mxu1 }
 0x7e4   : > { %v2743_v59 = vpop.f32.mrb[25].mxu1 }
 0x7e5   : > { %v1335_v61 = vpop.f32.mrb[26].mxu1  ;;  %v2939_v59 = vld [vmem:[%s3578_s20 + $0x80] ss:$16 sps:$4 sm:$0xff]  }
 0x7e6   : > { %v2870_v63 = vpack.i.bf16 %v1335_v61, %v1332_v58  ;;  %v2744_v0 = vpop.f32.mrb[27].mxu1  ;;  %v2944_v58 = vld [vmem:[%s3578_s20 + $0x8c] ss:$16 sps:$4 sm:$0xff]   ;;  %v2942_v61 = vld [vmem:[%s3578_s20 + $0x88] ss:$16 sps:$4 sm:$0xff]   ;;  %1743 = vmatpush1.bf16.msra.mxu1 %v2939_v59  ;;  %v2987_v59 = vld [vmem:[%s3580_s1 + $0x70] sm:$0xff]  }
 0x7e7   : > { %v2950_v0 = vld [vmem:[%s3578_s20 + $0xac] ss:$16 sps:$4 sm:$0xff]  }
 0x7e8   : > { %2871 = vrot.lane.b32.xlu1 %v2870_v63, %s3297_s22  ;;  %v2947_v63 = vld [vmem:[%s3578_s20 + $0xa4] ss:$16 sps:$4 sm:$0xff]  }
 0x7e9   : > { %1744 = vmatprep.subr.bf16.mxu1 %v2947_v63  ;;  %v2989_v63 = vld [vmem:[%s3580_s1 + $0x30] sm:$0xff]  }
 0x84a   : > { %v2862_v1 = vpop.permute.xlu1 %2861 }
 0x84b   : > { %v2864_v3 = vunpack.i.h.bf16 %v2862_v1  ;;  %v2863_v4 = vunpack.i.l.bf16 %v2862_v1  ;;  %v2945_v1 = vld [vmem:[%s3578_s20 + $0xa0] ss:$16 sps:$4 sm:$0xff]  }
 0x84c   : > { %1745 = vmatpush1.bf16.msra.mxu1 %v2945_v1  ;;  %v2991_v1 = vld [vmem:[%s3580_s1 + $0x78] sm:$0xff]  }
 0x84d   : > { %v1364_v10 = vsel %vm857_vm1, %v3728_v9, %v2864_v3  ;;  %v1363_v11 = vsel %vm857_vm1, %v3726_v5, %v2863_v4  ;;  %v1482_v9 = vrot.slane %v3656_v47, %v1481_v20  ;;  %v3067_v5 = vld [vmem:[#allocation2] sm:$0xff]  ;;  %v2956_v4 = vld [vmem:[%s3578_s20 + $0xcc] ss:$16 sps:$4 sm:$0xff]   ;;  %v1509_v20 = vsub.s32 6, %v3650_v45 }
 0x84e   : > { %v2953_v3 = vld [vmem:[%s3578_s20 + $0xc4] ss:$16 sps:$4 sm:$0xff]  }
 0x84f   : > { %1746 = vmatprep.subr.bf16.mxu1 %v2953_v3  ;;  %v2993_v3 = vld [vmem:[%s3580_s1 + $0x38] sm:$0xff]  }
 0x852   : > { %v2867_v2 = vpop.permute.xlu0 %2866 }
 0x853   : > { %v2869_v6 = vunpack.i.h.bf16 %v2867_v2  ;;  %v2868_v7 = vunpack.i.l.bf16 %v2867_v2  ;;  %v2948_v2 = vld [vmem:[%s3578_s20 + $0xa8] ss:$16 sps:$4 sm:$0xff]  }
 0x855   : > { %v1367_v14 = vsel %vm1365_vm11, %v1364_v10, %v2869_v6  ;;  %v1366_v15 = vsel %vm1365_vm11, %v1363_v11, %v2868_v7  ;;  %v2951_v6 = vld [vmem:[%s3578_s20 + $0xc0] ss:$16 sps:$4 sm:$0xff]   ;;  %v2954_v7 = vld [vmem:[%s3578_s20 + $0xc8] ss:$16 sps:$4 sm:$0xff]   ;;  %v2962_v10 = vld [vmem:[%s3578_s20 + $0xec] ss:$16 sps:$4 sm:$0xff]  }
 0x856   : > { %1747 = vmatpush1.bf16.msra.mxu1 %v2951_v6  ;;  %v2957_v11 = vld [vmem:[%s3578_s20 + $0xe0] ss:$16 sps:$4 sm:$0xff]  }
 0x857   : > { %v1552_v6 = vld [vmem:[%s3596_s29] sm:$0xf] }
 0x85a   : > { %v2872_v8 = vpop.permute.xlu1 %2871 }
 0x85b   : > { %v2874_v12 = vunpack.i.h.bf16 %v2872_v8  ;;  %v2873_v13 = vunpack.i.l.bf16 %v2872_v8  ;;  %v2959_v8 = vld [vmem:[%s3578_s20 + $0xe4] ss:$16 sps:$4 sm:$0xff]  }
 0x85c   : > { %1748 = vmatprep.subr.bf16.mxu1 %v2959_v8  ;;  %v1565_v8 = vrot.slane %v1552_v6, %v836_v60 }
 0x85d   : > { %v1370_v16 = vsel %vm1368_vm12, %v1367_v14, %v2874_v12  ;;  %v1369_v17 = vsel %vm1368_vm12, %v1366_v15, %v2873_v13  ;;  %v2960_v12 = vld [vmem:[%s3578_s20 + $0xe8] ss:$16 sps:$4 sm:$0xff]   ;;  %1749 = vmatpush1.bf16.msra.mxu1 %v2957_v11  ;;  %v1569_v11 = vrot.slane %v1552_v6, %v845_v62 }
 0x85e   : > { %v1371_v18 = vpack.c.bf16 %v1370_v16, %v1369_v17  ;;  %2633 = vmatprep.subr.bf16.mxu1 %v2963_v34 }
 0x860   : > { %2762 = vmatmul.mubr.bf16.vlgmr.msra.gmra.mrb[12].mxu0 %v1371_v18 }
 0x861   : > { %1809 = vmatprep.mubr.bf16.mxu0 %v3294_v32  ;;  %1778 = vmatpush1.bf16.msra.mxu0 %v2918_v33 }
 0x862   : > { %1779 = vmatprep.subr.bf16.mxu0 %v2926_v36  ;;  %v2965_v36 = vld [vmem:[%s3580_s1] sm:$0xff]  }
 0x865   : > { %1780 = vmatpush1.bf16.msra.mxu0 %v2924_v38  ;;  %v2968_v38 = vld [vmem:[%s3580_s1 + $0xc8] sm:$0xff]  }
 0x866   : > { %1781 = vmatprep.subr.bf16.mxu0 %v2932_v50  ;;  %v2978_v50 = vld [vmem:[%s3580_s1 + $0x98] sm:$0xff]  }
 0x869   : > { %1782 = vmatpush1.bf16.msra.mxu0 %v2930_v26  ;;  %v2980_v26 = vld [vmem:[%s3580_s1 + $0xe0] sm:$0xff]  }
 0x86a   : > { %1783 = vmatprep.subr.bf16.mxu0 %v2938_v54  ;;  %v2982_v54 = vld [vmem:[%s3580_s1 + $0xa0] sm:$0xff]  }
 0x86d   : > { %1784 = vmatpush1.bf16.msra.mxu0 %v2936_v56  ;;  %v2984_v56 = vld [vmem:[%s3580_s1 + $0xe8] sm:$0xff]  }
 0x86e   : > { %1785 = vmatprep.subr.bf16.mxu0 %v2944_v58  ;;  %v2986_v58 = vld [vmem:[%s3580_s1 + $0xa8] sm:$0xff]  }
 0x871   : > { %1786 = vmatpush1.bf16.msra.mxu0 %v2942_v61  ;;  %v2988_v61 = vld [vmem:[%s3580_s1 + $0xf0] sm:$0xff]  }
 0x872   : > { %1787 = vmatprep.subr.bf16.mxu0 %v2950_v0  ;;  %v2990_v0 = vld [vmem:[%s3580_s1 + $0xb0] sm:$0xff]  }
 0x875   : > { %1788 = vmatpush1.bf16.msra.mxu0 %v2948_v2  ;;  %v2992_v2 = vld [vmem:[%s3580_s1 + $0xf8] sm:$0xff]  }
 0x876   : > { %1789 = vmatprep.subr.bf16.mxu0 %v2956_v4  ;;  %v2994_v4 = vld [vmem:[%s3580_s1 + $0xb8] sm:$0xff]  }
 0x879   : > { %1790 = vmatpush1.bf16.msra.mxu0 %v2954_v7  ;;  %v1557_v7 = vrot.slane %v1552_v6, %v3653_v46 }
 0x87a   : > { %1791 = vmatprep.subr.bf16.mxu0 %v2962_v10  ;;  %v1561_v10 = vrot.slane %v1552_v6, %v3662_v51 }
 0x87d   : > { %1792 = vmatpush1.bf16.msra.mxu0 %v2960_v12 }
 0x87e   : > { %2655 = vmatprep.subr.bf16.mxu0 %v2964_v35 }
 0x933   : > { %v1470_v21 = vpop.f32.mrb[12].mxu0 }
 0x934   : > { %v1477_v22 = vadd.f32 %v3067_v5, %v1470_v21  ;;  %v2763_v19 = vpop.f32.mrb[13].mxu0  ;;  %v1510_v5 = vrot.slane %v3656_v47, %v1509_v20 }
 0x935   : > { %v1473_v23 = vpop.f32.mrb[14].mxu0 }
 0x936   : > { %v3789_v24 = vadd.f32 %v1482_v9, %v1477_v22  ;;  %v1478_v27 = vadd.f32 %v3068_v25, %v1473_v23  ;;  %v2764_v32 = vpop.f32.mrb[15].mxu0  ;;  %v1515_v22 = vsub.s32 7, %v3650_v45 }
 0x938   : > { %v3791_v29 = vadd.f32 %v1482_v9, %v1478_v27  ;;  %1485 = vadd.xlane.f32.xlu0 %v3789_v24  ;;  %v1516_v27 = vrot.slane %v3656_v47, %v1515_v22  ;;  %v2967_v47 = vld [vmem:[%s3580_s1 + $0x48] sm:$0xff]  }
 0x93a   : > { %1487 = vadd.xlane.f32.xlu1 %v3791_v29 }
 0x9c5   : > { %v1486_v39 = vpop.xlane.xlu0 %1485 }
 0x9c6   : > { %v1489_v40 = vmul.f32 0.0078125, %v1486_v39  ;;  %v2969_v39 = vld [vmem:[%s3580_s1 + $0x8] sm:$0xff]  }
 0x9c7   : > { %v1488_v41 = vpop.xlane.xlu1 %1487 }
 0x9c8   : > { %v3804_v42 = vsub.f32 %v3789_v24, %v1489_v40  ;;  %v1490_v28 = vmul.f32 0.0078125, %v1488_v41  ;;  %v2970_v40 = vld [vmem:[%s3580_s1 + $0x88] sm:$0xff]   ;;  %v2971_v41 = vld [vmem:[%s3580_s1 + $0x50] sm:$0xff]  }
 0x9ca   : > { %v3807_v43 = vsub.f32 %v3791_v29, %v1490_v28  ;;  %v1493_v44 = vmul.f32 %v3804_v42, %v3804_v42  ;;  %v2973_v28 = vld [vmem:[%s3580_s1 + $0x10] sm:$0xff]  }
 0x9cc   : > { %1495 = vadd.xlane.f32.xlu0 %v1493_v44  ;;  %v1494_v48 = vmul.f32 %v3807_v43, %v3807_v43  ;;  %v2975_v44 = vld [vmem:[%s3580_s1 + $0x58] sm:$0xff]  }
 0x9d0   : > { %1497 = vadd.xlane.f32.xlu0 %v1494_v48  ;;  %v2976_v48 = vld [vmem:[%s3580_s1 + $0xd8] sm:$0xff]  }
 0xa59   : > { %v1496_v13 = vpop.xlane.xlu0 %1495 }
 0xa5a   : > { %v1499_v14 = vmul.f32 0.0078125, %v1496_v13 }
 0xa5c   : > { %v1501_v15 = vadd.f32 1e-05, %v1499_v14 }
 0xa5d   : > { %v1498_v16 = vpop.xlane.xlu0 %1497 }
 0xa5e   : > { %3031 = vrsqrt.f32 %v1501_v15  ;;  %v1500_v17 = vmul.f32 0.0078125, %v1498_v16 }
 0xa60   : > { %v1502_v18 = vadd.f32 1e-05, %v1500_v17 }
 0xa62   : > { %3033 = vrsqrt.f32 %v1502_v18 }
 0xa68   : > { %v3032_v9 = vpop.eup %3031 }
 0xa69   : > { %v1505_v21 = vmul.f32 %v3032_v9, %v3804_v42  ;;  %v2972_v42 = vld [vmem:[%s3580_s1 + $0xd0] sm:$0xff]  }
 0xa6b   : > { %v1511_v25 = vmul.f32 %v1510_v5, %v1505_v21 }
 0xa6c   : > { %v3034_v19 = vpop.eup %3033 }
 0xa6d   : > { %v1506_v23 = vmul.f32 %v3034_v19, %v3807_v43  ;;  %v1517_v30 = vadd.f32 %v1516_v27, %v1511_v25  ;;  %v2974_v43 = vld [vmem:[%s3580_s1 + $0x90] sm:$0xff]  }
 0xa6f   : > { %v1512_v32 = vmul.f32 %v1510_v5, %v1506_v23 }
 0xa71   : > { %v1518_v31 = vadd.f32 %v1516_v27, %v1512_v32 }
 0xa73   : > { %v1519_v33 = vpack.c.bf16 %v1518_v31, %v1517_v30 }
 0xa75   : > { %1767 = vmatmul.mubr.bf16.vlgmr.msra.gmra.mrb[28].mxu1 %v1519_v33  ;;  %1810 = vmatmul.mubr.bf16.vlgmr.msra.gmra.mrb[16].mxu0 %v1519_v33 }
 0xa76   : > { %2634 = vmatpush3.bf16.msra.mxu1 %v2965_v36  ;;  %2656 = vmatpush3.bf16.msra.mxu0 %v2966_v37 }
 0xa77   : > { %2635 = vmatprep.subr.bf16.mxu1 %v2967_v47  ;;  %2657 = vmatprep.subr.bf16.mxu0 %v2968_v38 }
 0xa7a   : > { %2636 = vmatpush3.bf16.msra.mxu1 %v2969_v39  ;;  %2658 = vmatpush3.bf16.msra.mxu0 %v2970_v40 }
 0xa7b   : > { %2637 = vmatprep.subr.bf16.mxu1 %v2971_v41  ;;  %2659 = vmatprep.subr.bf16.mxu0 %v2972_v42 }
 0xa7e   : > { %2638 = vmatpush3.bf16.msra.mxu1 %v2973_v28  ;;  %2660 = vmatpush3.bf16.msra.mxu0 %v2974_v43 }
 0xa7f   : > { %2639 = vmatprep.subr.bf16.mxu1 %v2975_v44  ;;  %2661 = vmatprep.subr.bf16.mxu0 %v2976_v48 }
 0xa82   : > { %2640 = vmatpush3.bf16.msra.mxu1 %v2977_v49  ;;  %2662 = vmatpush3.bf16.msra.mxu0 %v2978_v50 }
 0xa83   : > { %2641 = vmatprep.subr.bf16.mxu1 %v2979_v52  ;;  %2663 = vmatprep.subr.bf16.mxu0 %v2980_v26 }
 0xa86   : > { %2642 = vmatpush3.bf16.msra.mxu1 %v2981_v53  ;;  %2664 = vmatpush3.bf16.msra.mxu0 %v2982_v54 }
 0xa87   : > { %2643 = vmatprep.subr.bf16.mxu1 %v2983_v55  ;;  %2665 = vmatprep.subr.bf16.mxu0 %v2984_v56 }
 0xa8a   : > { %2644 = vmatpush3.bf16.msra.mxu1 %v2985_v57  ;;  %2666 = vmatpush3.bf16.msra.mxu0 %v2986_v58 }
 0xa8b   : > { %2645 = vmatprep.subr.bf16.mxu1 %v2987_v59  ;;  %2667 = vmatprep.subr.bf16.mxu0 %v2988_v61 }
 0xa8e   : > { %2646 = vmatpush3.bf16.msra.mxu1 %v2989_v63  ;;  %2668 = vmatpush3.bf16.msra.mxu0 %v2990_v0 }
 0xa8f   : > { %2647 = vmatprep.subr.bf16.mxu1 %v2991_v1  ;;  %2669 = vmatprep.subr.bf16.mxu0 %v2992_v2 }
 0xa92   : > { %2648 = vmatpush3.bf16.msra.mxu1 %v2993_v3  ;;  %2670 = vmatpush3.bf16.msra.mxu0 %v2994_v4 }
 0xb48   : > { %v1768_v12 = vpop.f32.mrb[28].mxu1  ;;  %v1811_v13 = vpop.f32.mrb[16].mxu0 }
 0xb49   : > { %v3882_v14 = vadd.f32 %v1768_v12, %v1557_v7  ;;  %v3884_v15 = vadd.f32 %v1811_v13, %v1565_v8  ;;  %v1770_v16 = vpop.f32.mrb[29].mxu1  ;;  %v1813_v17 = vpop.f32.mrb[17].mxu0 }
 0xb4a   : > { %v3886_v18 = vadd.f32 %v1770_v16, %v1561_v10  ;;  %v3888_v20 = vadd.f32 %v1813_v17, %v1569_v11  ;;  %v1772_v9 = vpop.f32.mrb[30].mxu1  ;;  %v1815_v21 = vpop.f32.mrb[18].mxu0 }
 0xb4b   : > { %v2549_v60 = vmul.f32 -1.702, %v3882_v14  ;;  %v2551_v5 = vmul.f32 -1.702, %v3884_v15  ;;  %v1773_v45 = vadd.f32 %v1772_v9, %v1557_v7  ;;  %v1816_v62 = vadd.f32 %v1815_v21, %v1565_v8  ;;  %v1774_v22 = vpop.f32.mrb[31].mxu1  ;;  %v1817_v19 = vpop.f32.mrb[19].mxu0 }
 0xb4c   : > { %v2550_v23 = vmul.f32 -1.702, %v3886_v18  ;;  %v2552_v25 = vmul.f32 -1.702, %v3888_v20  ;;  %v1775_v27 = vadd.f32 %v1774_v22, %v1561_v10  ;;  %v1818_v32 = vadd.f32 %v1817_v19, %v1569_v11 }
 0xb4d   : > { %v1836_v30 = vmul.f32 1.442695, %v2549_v60  ;;  %v1840_v31 = vmul.f32 1.442695, %v2551_v5  ;;  %v2553_v33 = vmul.f32 -1.702, %v1773_v45 }
 0xb4e   : > { %v1838_v34 = vmul.f32 1.442695, %v2550_v23  ;;  %v1842_v35 = vmul.f32 1.442695, %v2552_v25  ;;  %v2555_v36 = vmul.f32 -1.702, %v1816_v62 }
 0xb4f   : > { %3035 = vpow2.f32 %v1836_v30  ;;  %v1844_v37 = vmul.f32 1.442695, %v2553_v33  ;;  %v2554_v47 = vmul.f32 -1.702, %v1775_v27  ;;  %v2556_v38 = vmul.f32 -1.702, %v1818_v32 }
 0xb50   : > { %3037 = vpow2.f32 %v1840_v31  ;;  %v1848_v39 = vmul.f32 1.442695, %v2555_v36  ;;  %v2589_v31 = vld [vmem:[%s3591_s2 + $0x8] ss:$0 sm:$0xff] }
 0xb51   : > { %3039 = vpow2.f32 %v1838_v34  ;;  %v1846_v40 = vmul.f32 1.442695, %v2554_v47  ;;  %v1850_v41 = vmul.f32 1.442695, %v2556_v38 }
 0xb52   : > { %3041 = vpow2.f32 %v1842_v35 }
 0xb53   : > { %3043 = vpow2.f32 %v1844_v37 }
 0xb54   : > { %3045 = vpow2.f32 %v1848_v39 }
 0xb55   : > { %3047 = vpow2.f32 %v1846_v40 }
 0xb56   : > { %3049 = vpow2.f32 %v1850_v41 }
 0xb59   : > { %v3036_v42 = vpop.eup %3035 }
 0xb5a   : > { %v3038_v28 = vpop.eup %3037  ;;  %v1852_v43 = vadd.f32 1.0, %v3036_v42 }
 0xb5b   : > { %v3040_v44 = vpop.eup %3039  ;;  %v1854_v48 = vadd.f32 1.0, %v3038_v28 }
 0xb5c   : > { %v3042_v49 = vpop.eup %3041  ;;  %3051 = vrcp.f32 %v1852_v43  ;;  %v1853_v50 = vadd.f32 1.0, %v3040_v44 }
 0xb5d   : > { %v3044_v52 = vpop.eup %3043  ;;  %3053 = vrcp.f32 %v1854_v48  ;;  %v1855_v26 = vadd.f32 1.0, %v3042_v49 }
 0xb5e   : > { %v3046_v53 = vpop.eup %3045  ;;  %3055 = vrcp.f32 %v1853_v50  ;;  %v1856_v54 = vadd.f32 1.0, %v3044_v52  ;;  %v2240_v52 = vld [vmem:[%s3955_s7] sm:$0x3] (!%p2590_p6) }
 0xb5f   : > { %v3048_v55 = vpop.eup %3047  ;;  %3057 = vrcp.f32 %v1855_v26  ;;  %v1858_v56 = vadd.f32 1.0, %v3046_v53  ;;  %v2266_v26 = vrot.slane (!%p2590_p6), %v2240_v52, %v3653_v46 }
 0xb60   : > { %v3050_v57 = vpop.eup %3049  ;;  %3059 = vrcp.f32 %v1856_v54  ;;  %v1857_v58 = vadd.f32 1.0, %v3048_v55  ;;  %v2272_v55 = vrot.slane (!%p2590_p6), %v2240_v52, %v3662_v51 }
 0xb61   : > { %3061 = vrcp.f32 %v1858_v56  ;;  %v1859_v59 = vadd.f32 1.0, %v3050_v57 }
 0xb62   : > { %3063 = vrcp.f32 %v1857_v58 }
 0xb63   : > { %3065 = vrcp.f32 %v1859_v59 }
 0xb66   : > { %v3052_v61 = vpop.eup %3051 }
 0xb67   : > { %v3054_v63 = vpop.eup %3053  ;;  %v1876_v4 = vmul.f32 %v3052_v61, %v3882_v14 }
 0xb68   : > { %v3056_v0 = vpop.eup %3055  ;;  %v1878_v8 = vmul.f32 %v3054_v63, %v3884_v15 }
 0xb69   : > { %v3058_v1 = vpop.eup %3057  ;;  %v1877_v12 = vmul.f32 %v3056_v0, %v3886_v18 }
 0xb6a   : > { %v3060_v2 = vpop.eup %3059  ;;  %v1879_v17 = vmul.f32 %v3058_v1, %v3888_v20 }
 0xb6b   : > { %v3062_v3 = vpop.eup %3061  ;;  %v1880_v6 = vmul.f32 %v3060_v2, %v1773_v45 }
 0xb6c   : > { %v3064_v7 = vpop.eup %3063  ;;  %v1882_v10 = vmul.f32 %v3062_v3, %v1816_v62 }
 0xb6d   : > { %v3066_v11 = vpop.eup %3065  ;;  %v1884_v13 = vpack.c.bf16 %v1880_v6, %v1876_v4  ;;  %v1881_v16 = vmul.f32 %v3064_v7, %v1775_v27 }
 0xb6e   : > { %v1886_v9 = vpack.c.bf16 %v1882_v10, %v1878_v8  ;;  %v1883_v21 = vmul.f32 %v3066_v11, %v1818_v32 }
 0xb6f   : > { %v1885_v60 = vpack.c.bf16 %v1881_v16, %v1877_v12 }
 0xb70   : > { %v1887_v5 = vpack.c.bf16 %v1883_v21, %v1879_v17 }
 0xb71   : > { %2176 = vmatprep.mubr.bf16.mxu1 %v1885_v60 }
 0xb72   : > { %2217 = vmatprep.mubr.bf16.mxu0 %v1887_v5  ;;  %2177 = vmatmul.mubr.bf16.vlgmr.msra.gmra.mrb[32].mxu1 %v1884_v13 }
 0xb73   : > { %2218 = vmatmul.mubr.bf16.vlgmr.msra.gmra.mrb[20].mxu0 %v1886_v9 }
 0xc45   : > { %v2649_v14 = vpop.f32.mrb[32].mxu1 }
 0xc46   : > { %v2671_v45 = vpop.f32.mrb[20].mxu0  ;;  %v2650_v15 = vpop.f32.mrb[33].mxu1 }
 0xc47   : > { %v2651_v62 = vadd.f32 %v2650_v15, %v2649_v14  ;;  %v2672_v22 = vpop.f32.mrb[21].mxu0  ;;  %v2652_v19 = vpop.f32.mrb[34].mxu1 }
 0xc48   : > { %v2673_v18 = vadd.f32 %v2672_v22, %v2671_v45  ;;  %v2674_v23 = vpop.f32.mrb[22].mxu0  ;;  %v2653_v25 = vpop.f32.mrb[35].mxu1 }
 0xc49   : > { %v2654_v27 = vadd.f32 %v2653_v25, %v2652_v19  ;;  %v2675_v20 = vpop.f32.mrb[23].mxu0 }
 0xc4a   : > { %v2220_v30 = vadd.f32 %v2673_v18, %v2651_v62  ;;  %v2676_v32 = vadd.f32 %v2675_v20, %v2674_v23 }
 0xc4c   : > { %v2226_v33 = vadd.f32 %v2220_v30, %v3789_v24  ;;  %v2223_v34 = vadd.f32 %v2676_v32, %v2654_v27  ;;  %2239 = sbr.rel (%p2590_p6) target bundleno = 3468 (0xd8c), region = 76 }
 0xc4e   : > { %v2232_v35 = vadd.f32 %v2589_v31, %v2226_v33  ;;  %v2227_v36 = vadd.f32 %v2223_v34, %v3791_v29 }
 0xc50   : > { %2234 = vst [vmem:[#allocation2] sm:$0xff] %v2232_v35  ;;  %v2233_v37 = vadd.f32 %v2589_v31, %v2227_v36  ;;  %2241 = vadd.xlane.f32.xlu0 (!%p2590_p6), %v2232_v35 }
 0xc52   : > { %2235 = vst [vmem:[#allocation2 + $0x8] sm:$0xff] %v2233_v37 }
 0xc54   : > { %2243 = vadd.xlane.f32.xlu0 %v2233_v37 }
 0xcdd   : > { %v2242_v47 = vpop.xlane.xlu0 %2241 }
 0xcde   : > { %v2245_v38 = vmul.f32 0.0078125, %v2242_v47 }
 0xce0   : > { %v2247_v39 = vsub.f32 %v2232_v35, %v2245_v38 }
 0xce1   : > { %v2244_v40 = vpop.xlane.xlu0 %2243 }
 0xce2   : > { %v2246_v41 = vmul.f32 0.0078125, %v2244_v40  ;;  %v2249_v42 = vmul.f32 %v2247_v39, %v2247_v39 }
 0xce4   : > { %v2248_v28 = vsub.f32 %v2233_v37, %v2246_v41  ;;  %2251 = vadd.xlane.f32.xlu1 %v2249_v42 }
 0xce6   : > { %v2250_v24 = vmul.f32 %v2248_v28, %v2248_v28 }
 0xce8   : > { %2253 = vadd.xlane.f32.xlu1 %v2250_v24 }
 0xd71   : > { %v2252_v43 = vpop.xlane.xlu1 %2251 }
 0xd72   : > { %v2255_v29 = vmul.f32 0.0078125, %v2252_v43 }
 0xd74   : > { %v2257_v44 = vadd.f32 1e-05, %v2255_v29 }
 0xd75   : > { %v2254_v48 = vpop.xlane.xlu1 %2253 }
 0xd76   : > { %3069 = vrsqrt.f32 %v2257_v44  ;;  %v2256_v49 = vmul.f32 0.0078125, %v2254_v48 }
 0xd78   : > { %v2258_v50 = vadd.f32 1e-05, %v2256_v49 }
 0xd7a   : > { %3071 = vrsqrt.f32 %v2258_v50 }
 0xd80   : > { %v3070_v53 = vpop.eup %3069 }
 0xd81   : > { %v2261_v54 = vmul.f32 %v3070_v53, %v2247_v39 }
 0xd83   : > { %v2267_v56 = vmul.f32 %v2266_v26, %v2261_v54 }
 0xd84   : > { %v3072_v57 = vpop.eup %3071 }
 0xd85   : > { %v2273_v58 = vadd.f32 %v2272_v55, %v2267_v56  ;;  %v2262_v59 = vmul.f32 %v3072_v57, %v2248_v28 }
 0xd87   : > { %2275 = vst [vmem:[#allocation11] sm:$0xff] %v2273_v58  ;;  %v2268_v61 = vmul.f32 %v2266_v26, %v2262_v59 }
 0xd89   : > { %v2274_v63 = vadd.f32 %v2272_v55, %v2268_v61 }
 0xd8b   : > { %2276 = vst [vmem:[#allocation11 + $0x8] sm:$0xff] %v2274_v63 }
 0xd8c PF: > { %p2794_p8 = scmp.eq.s32.totalorder %s3377_s11, 1  ;;  %s3300_s20 = smov [#allocation11]  }
 0xd8d   : > { %s2286_s1 = sshll.u32 %s3300_s20, 4  ;;  %s2287_s1 = int_to_ptr.vmem [resolvable:$true] %s2286_s1 }
 0xd8e   : > { %s3193_s24 = scalar_lea.vmem %s2287_s1, 256  ;;  %p3200_p1 = scmp.lt.s32.totalorder %s2287_s1, %s2287_s1 }
 0xd8f   : > { %p3194_p0 = scmp.ne.s32.totalorder %s2287_s1, %s3193_s24  ;;  %p3201_p11 = scmp.lt.s32.totalorder %s3193_s24, %s3193_s24 }
 0xd91   : > { %p3195_p5 = pnand %p3194_p0, %p2794_p8  ;;  %p3202_p2 = por %p3201_p11, %p3200_p1 }
 0xd93   : > { %p3196_p13 = pneg %p3195_p5 }
 0xd95   : > { %p3203_p10 = pnand %p3202_p2, %p3196_p13 }
 0xd97   : > { %3206 = shalt.err (!%p3203_p10)
}
 0xd98   : > { %s3207_s13 = scalar_lea.hbm %s3956_s8, 256 }
 0xd99   : > { %p3208_p3 = scmp.ne.s32.totalorder %s3956_s8, %s3207_s13  ;;  %p3213_p9 = scmp.lt.u32.totalorder %s3207_s13, %s3956_s8 }
 0xd9b   : > { %p3209_p12 = pnand %p3208_p3, %p2794_p8 }
 0xd9d   : > { %p3210_p7 = pneg %p3209_p12 }
 0xd9f   : > { %p3215_p4 = pnand %p3213_p9, %p3210_p7 }
 0xda1   : > { %3218 = shalt.err (!%p3215_p4)
}
 0xda2   : > { %s3301_s29 = smov 128   ;;  %s3302_s15 = smov 8  }
 0xda3   : > { %2777 = dma.vmem_to_hbm [thread:$0]  (%p2794_p8), %s2287_s1, 256, %s3956_s8, [#allocation5], %s3301_s29, %s3301_s29, %s3302_s15  }
 0xda4   : > { %3256 = dma.done.wait (%p2794_p8), [#allocation5], 256  }
 0xda5   : > { %3258 = vsyncadd (%p2794_p8), [#allocation5], 4294967040 }
 0xda6 PF: > { %s28_s10 = sadd.s32 1, %s3281_s10   ;;  %s3978_s21 = sld [smem:[#allocation16_spill]] }
 0xda7   : > { %p25_p6 = scmp.ge.s32.totalorder %s28_s10, 4   ;;  %s3979_s29 = sld [smem:[#allocation18_spill]] }
 0xda8   : > { %s3980_s22 = sld [smem:[#allocation17_spill]]  ;;  %s3981_s27 = smov %s3265_s28 }
 0xda9   : > { %s3983_s30 = smov %s3277_s9  ;;  %27 = sbr.rel (!%p25_p6) target bundleno = 12 (0xc), region = 144 }
 0xdac   : > { %s3982_s28 = smov %s3978_s21 }
 0xdae   : > { %s3984_s9 = smov %s3980_s22 }
 0xdb0   :  { %2302 = vsyncpa [#allocation4], 1 }
 0xdb1   :  { %2304 = vsyncpa [#allocation4 + $0x1], 1 }
 0xdb2   :  { %2305 = vsyncpa [#allocation7], 1 }
 0xdb3   :  { %2307 = vsyncpa [#allocation7 + $0x1], 1 }
 0xdb4   :  { %2308 = vsyncpa [#allocation10], 1 }
 0xdb5   :  { %2310 = vsyncpa [#allocation10 + $0x1], 1 }
 0xdb6   :  { %2311 = vsyncpa [#allocation5], 1 }
 0xdb7   :  { %2313 = vsyncpa [#allocation5 + $0x1], 1 }

</bundles_post_ra>
